<compile_context>
chip_gen: v5e
topology: v5e:2x2
jax: 0.10.0
libtpu: 0.0.40
codegen_flags: <defaults>
</compile_context>

<pallas_src>
import jax
import jax.numpy as jnp
import numpy as np
from jax import lax
from jax.experimental import pallas as pl
from jax.experimental.pallas import tpu as pltpu

K = 4        # ConvTranspose2d kernel_size
S = 2        # stride
P = 1        # padding
H = W = 4    # the module hardcodes a.reshape((1, 128, 4, 4))
CIN = 128
NWIN = 3     # 3x3 padded-window offsets cover both sub-pixel phases per axis
EPS_NORM = 1e-12   # F.normalize eps


def _pack_convT_weight(w_ct):
    """(Cin, Cout, 4, 4) ConvTranspose2d weight -> (9*Cin, 4*Cout) phase-packed matrix.

    Row (oy*3+ox)*Cin + ci multiplies window offset (oy, ox) of the zero-padded input;
    column (py*2+px)*Cout + co produces output sub-pixel phase (py, px), channel co.
    Entries for (phase, offset) pairs that do not interact are zero.
    """
    cin, cout = w_ct.shape[0], w_ct.shape[1]
    wbig = jnp.zeros((NWIN, NWIN, cin, 2, 2, cout), w_ct.dtype)
    for py in range(2):
        for oy in range(NWIN):
            if not 0 <= oy - py <= 1:
                continue
            kh = 3 + py - 2 * oy          # tap index used by phase py at offset oy
            for px in range(2):
                for ox in range(NWIN):
                    if not 0 <= ox - px <= 1:
                        continue
                    kw = 3 + px - 2 * ox
                    wbig = wbig.at[oy, ox, :, py, px, :].set(w_ct[:, :, kh, kw])
    return wbig.reshape(NWIN * NWIN * cin, 4 * cout)


def _make_kernel(order_nc, cout):
    cols = 4 * cout   # 4 phases stacked on the lane axis

    def kernel(td_ref, wfc_ref, bfc_ref, wcv_ref, bcv_ref, x_ref, o_ref, xp_ref):
        # td_ref : SMEM (order_nc,)            topdown class signal
        # wfc_ref: VMEM (order_nc, 16, CIN)    fc_back weight, (hw, c)-major output
        # bfc_ref: VMEM (16, CIN)              fc_back bias, (hw, c) layout
        # wcv_ref: VMEM (9*CIN, 4*cout)        phase-packed ConvTranspose2d weight
        # bcv_ref: VMEM (1, 4*cout)            conv bias tiled over the 4 phases
        # x_ref  : VMEM (1, 16, CIN)           one sample, NHWC-flattened
        # o_ref  : VMEM (1, 16, 4*cout)        phase-stacked, lane-dense output tile
        # xp_ref : VMEM scratch (6, 6, CIN)    zero-padded modulated input

        # --- fc_back + sigmoid + L2-normalize * 100, directly in (hw, c) layout ---
        a = bfc_ref[...]                                       # (16, CIN) f32
        for k in range(order_nc):                              # unrolled scalar FMAs
            a = a + td_ref[k] * wfc_ref[k]
        a = 1.0 / (1.0 + jnp.exp(-a))                          # sigmoid (EUP)
        nrm = jnp.sqrt(jnp.sum(a * a))
        a = a * (100.0 / jnp.maximum(nrm, EPS_NORM))

        # --- modulate x and place into the zero-padded scratch ---
        xm = a * x_ref[0]                                      # (16, CIN)
        xp_ref[...] = jnp.zeros((H + 2, W + 2, CIN), jnp.float32)
        xp_ref[pl.ds(1, H), pl.ds(1, W), :] = xm.reshape(H, W, CIN)

        # --- transposed conv: 9 deep matmuls, 4 output phases stacked on lanes ---
        acc = jnp.zeros((H * W, cols), jnp.float32)
        for oy in range(NWIN):
            for ox in range(NWIN):
                win = xp_ref[pl.ds(oy, H), pl.ds(ox, W), :]    # (4, 4, CIN)
                patch = win.reshape(H * W, CIN)                # (16, 128)
                o = oy * NWIN + ox
                acc = acc + jnp.dot(patch,
                                    wcv_ref[pl.ds(o * CIN, CIN), :],
                                    preferred_element_type=jnp.float32)
        acc = acc + bcv_ref[...]                               # (1, 4*cout) broadcast
        o_ref[0] = acc.astype(o_ref.dtype)

    return kernel


def fb_decoder_top_block(x, topdown, w_fc, b_fc, w_ct, b_ct):
    """x: (N, 128, 4, 4); topdown: (order_nc,); w_fc: (2048, order_nc); b_fc: (2048,);
    w_ct: (128, Cout, 4, 4) ConvTranspose2d weight; b_ct: (Cout,)."""
    N = x.shape[0]
    cout = w_ct.shape[1]
    order_nc = topdown.shape[-1]
    assert x.shape[1:] == (CIN, H, W) and w_ct.shape[0] == CIN
    assert w_fc.shape == (CIN * H * W, order_nc)

    # ---- wrapper-side layout glue (no arithmetic on activations) ----
    x_hwc = jnp.transpose(x, (0, 2, 3, 1)).reshape(N, H * W, CIN)

    # Reorder fc_back's 2048 outputs from (c, hw) to (hw, c) so the kernel builds `a`
    # directly lane-dense.  sigmoid is elementwise and the L2 norm is permutation
    # invariant, so this is pure layout.
    wfc_k = jnp.transpose(w_fc.reshape(CIN, H * W, order_nc), (2, 1, 0))  # (order,16,128)
    bfc_k = jnp.transpose(b_fc.reshape(CIN, H * W), (1, 0))               # (16,128)

    wcv_k = _pack_convT_weight(w_ct)                                      # (9*128, 4*Cout)
    bcv_k = jnp.tile(b_ct, 4).reshape(1, 4 * cout)

    kernel = _make_kernel(order_nc, cout)
    out = pl.pallas_call(
        kernel,
        out_shape=jax.ShapeDtypeStruct((N, H * W, 4 * cout), jnp.float32),
        grid=(N,),
        in_specs=[
            pl.BlockSpec(memory_space=pltpu.MemorySpace.SMEM),               # topdown
            pl.BlockSpec((order_nc, H * W, CIN), lambda n: (0, 0, 0)),       # fc weight
            pl.BlockSpec((H * W, CIN), lambda n: (0, 0)),                    # fc bias
            pl.BlockSpec((NWIN * NWIN * CIN, 4 * cout), lambda n: (0, 0)),   # conv weight
            pl.BlockSpec((1, 4 * cout), lambda n: (0, 0)),                   # conv bias
            pl.BlockSpec((1, H * W, CIN), lambda n: (n, 0, 0)),              # x
        ],
        out_specs=pl.BlockSpec((1, H * W, 4 * cout), lambda n: (n, 0, 0)),
        scratch_shapes=[pltpu.VMEM((H + 2, W + 2, CIN), jnp.float32)],
        compiler_params=pltpu.CompilerParams(dimension_semantics=("parallel",)),
    )(topdown, wfc_k, bfc_k, wcv_k, bcv_k, x_hwc)

    # De-interleave the 4 sub-pixel phases (pure layout):
    # out[n, ty*4+tx, (py*2+px)*Cout+co] -> NCHW (n, co, 2*ty+py, 2*tx+px)
    y = out.reshape(N, H, W, 2, 2, cout)            # [n, ty, tx, py, px, co]
    y = jnp.transpose(y, (0, 1, 3, 2, 4, 5))        # [n, ty, py, tx, px, co]
    y = y.reshape(N, 2 * H, 2 * W, cout)            # NHWC
    return jnp.transpose(y, (0, 3, 1, 2))           # NCHW


def fb_decoder_top_block_ref(x, topdown, w_fc, b_fc, w_ct, b_ct):
    """Pure-JAX reference matching the PyTorch forward, for validation."""
    a = topdown[None, :] @ w_fc.T + b_fc[None, :]                  # nn.Linear
    a = jax.nn.sigmoid(a)
    nrm = jnp.sqrt(jnp.sum(a * a, axis=1, keepdims=True))
    a = a / jnp.maximum(nrm, EPS_NORM) * 100.0                     # F.normalize(dim=1)*100
    a = a.reshape(1, CIN, H, W)
    xm = a * x
    w_oihw = jnp.transpose(w_ct[:, :, ::-1, ::-1], (1, 0, 2, 3))
    out = lax.conv_general_dilated(
        xm, w_oihw, window_strides=(1, 1),
        padding=[(K - 1 - P, K - 1 - P)] * 2,
        lhs_dilation=(S, S),
        dimension_numbers=("NCHW", "OIHW", "NCHW"),
        precision=lax.Precision.HIGHEST)
    return out + b_ct.reshape(1, -1, 1, 1)


if __name__ == "__main__":
    key = jax.random.PRNGKey(0)
    N = 2
    ORDER_NC = 16       # input_order_nc (topdown one-hot width)
    COUT = 64           # output_nc
    # input_nc = 128 and 4x4 spatial are hardcoded by the module's reshape

    k1, k2, k3, k4, k5, k6 = jax.random.split(key, 6)
    x = jax.random.normal(k1, (N, CIN, H, W), jnp.float32)
    cls = jax.random.randint(k2, (), 0, ORDER_NC)
    topdown = jax.nn.one_hot(cls, ORDER_NC, dtype=jnp.float32)                 # (16,)
    w_fc = jax.random.normal(k3, (CIN * H * W, ORDER_NC), jnp.float32) / np.sqrt(ORDER_NC)
    b_fc = jax.random.normal(k4, (CIN * H * W,), jnp.float32) * 0.1
    w_ct = jax.random.normal(k5, (CIN, COUT, K, K), jnp.float32) / np.sqrt(CIN * K * K)
    b_ct = jax.random.normal(k6, (COUT,), jnp.float32) * 0.1

    out = fb_decoder_top_block(x, topdown, w_fc, b_fc, w_ct, b_ct)
    jax.block_until_ready(out)
    assert out.shape == (N, COUT, 2 * H, 2 * W)

    ref = fb_decoder_top_block_ref(x, topdown, w_fc, b_fc, w_ct, b_ct)
    np.testing.assert_allclose(np.asarray(out), np.asarray(ref), rtol=2e-4, atol=2e-4)

    print("KERNEL_OK")
</pallas_src>

<mosaic_0001>
module attributes {stable_mosaic.version = 11 : i64} {
  func.func @kernel(%arg0: i32, %arg1: memref<16xf32, #tpu.memory_space<smem>>, %arg2: memref<16x16x128xf32, #tpu.memory_space<vmem>>, %arg3: memref<16x128xf32, #tpu.memory_space<vmem>>, %arg4: memref<1152x256xf32, #tpu.memory_space<vmem>>, %arg5: memref<1x256xf32, #tpu.memory_space<vmem>>, %arg6: memref<1x16x128xf32, #tpu.memory_space<vmem>>, %arg7: memref<1x16x256xf32, #tpu.memory_space<vmem>>, %arg8: memref<6x6x128xf32, #tpu.memory_space<vmem>>) attributes {dimension_semantics = [#tpu.dimension_semantics<parallel>], iteration_bounds = array<i64: 2>, scalar_prefetch = 0 : i64, scratch_operands = 1 : i64, tpu.core_type = #tpu.core_type<tc>, window_params = [{transform_indices = @transform_0, window_bounds = array<i64: 16>}, {pipeline_mode = #tpu.pipeline_mode<synchronous>, transform_indices = @transform_1, window_bounds = array<i64: 16, 16, 128>}, {pipeline_mode = #tpu.pipeline_mode<synchronous>, transform_indices = @transform_2, window_bounds = array<i64: 16, 128>}, {pipeline_mode = #tpu.pipeline_mode<synchronous>, transform_indices = @transform_3, window_bounds = array<i64: 1152, 256>}, {pipeline_mode = #tpu.pipeline_mode<synchronous>, transform_indices = @transform_4, window_bounds = array<i64: 1, 256>}, {transform_indices = @transform_5, window_bounds = array<i64: 1, 16, 128>}, {transform_indices = @transform_6, window_bounds = array<i64: 1, 16, 256>}]} {
    %c0 = arith.constant 0 : index
    %c0_0 = arith.constant 0 : index
    %0 = vector.load %arg3[%c0, %c0_0] : memref<16x128xf32, #tpu.memory_space<vmem>>, vector<16x128xf32>
    %c0_1 = arith.constant 0 : index
    %1 = memref.load %arg1[%c0_1] : memref<16xf32, #tpu.memory_space<smem>>
    %c0_2 = arith.constant 0 : index
    %c0_3 = arith.constant 0 : index
    %c0_4 = arith.constant 0 : index
    %2 = vector.load %arg2[%c0_2, %c0_3, %c0_4] : memref<16x16x128xf32, #tpu.memory_space<vmem>>, vector<1x16x128xf32>
    %3 = vector.shape_cast %2 : vector<1x16x128xf32> to vector<16x128xf32>
    %4 = vector.broadcast %1 : f32 to vector<16x128xf32>
    %5 = arith.mulf %4, %3 : vector<16x128xf32>
    %6 = arith.addf %0, %5 : vector<16x128xf32>
    %c1 = arith.constant 1 : index
    %7 = memref.load %arg1[%c1] : memref<16xf32, #tpu.memory_space<smem>>
    %c1_5 = arith.constant 1 : index
    %c0_6 = arith.constant 0 : index
    %c0_7 = arith.constant 0 : index
    %8 = vector.load %arg2[%c1_5, %c0_6, %c0_7] : memref<16x16x128xf32, #tpu.memory_space<vmem>>, vector<1x16x128xf32>
    %9 = vector.shape_cast %8 : vector<1x16x128xf32> to vector<16x128xf32>
    %10 = vector.broadcast %7 : f32 to vector<16x128xf32>
    %11 = arith.mulf %10, %9 : vector<16x128xf32>
    %12 = arith.addf %6, %11 : vector<16x128xf32>
    %c2 = arith.constant 2 : index
    %13 = memref.load %arg1[%c2] : memref<16xf32, #tpu.memory_space<smem>>
    %c2_8 = arith.constant 2 : index
    %c0_9 = arith.constant 0 : index
    %c0_10 = arith.constant 0 : index
    %14 = vector.load %arg2[%c2_8, %c0_9, %c0_10] : memref<16x16x128xf32, #tpu.memory_space<vmem>>, vector<1x16x128xf32>
    %15 = vector.shape_cast %14 : vector<1x16x128xf32> to vector<16x128xf32>
    %16 = vector.broadcast %13 : f32 to vector<16x128xf32>
    %17 = arith.mulf %16, %15 : vector<16x128xf32>
    %18 = arith.addf %12, %17 : vector<16x128xf32>
    %c3 = arith.constant 3 : index
    %19 = memref.load %arg1[%c3] : memref<16xf32, #tpu.memory_space<smem>>
    %c3_11 = arith.constant 3 : index
    %c0_12 = arith.constant 0 : index
    %c0_13 = arith.constant 0 : index
    %20 = vector.load %arg2[%c3_11, %c0_12, %c0_13] : memref<16x16x128xf32, #tpu.memory_space<vmem>>, vector<1x16x128xf32>
    %21 = vector.shape_cast %20 : vector<1x16x128xf32> to vector<16x128xf32>
    %22 = vector.broadcast %19 : f32 to vector<16x128xf32>
    %23 = arith.mulf %22, %21 : vector<16x128xf32>
    %24 = arith.addf %18, %23 : vector<16x128xf32>
    %c4 = arith.constant 4 : index
    %25 = memref.load %arg1[%c4] : memref<16xf32, #tpu.memory_space<smem>>
    %c4_14 = arith.constant 4 : index
    %c0_15 = arith.constant 0 : index
    %c0_16 = arith.constant 0 : index
    %26 = vector.load %arg2[%c4_14, %c0_15, %c0_16] : memref<16x16x128xf32, #tpu.memory_space<vmem>>, vector<1x16x128xf32>
    %27 = vector.shape_cast %26 : vector<1x16x128xf32> to vector<16x128xf32>
    %28 = vector.broadcast %25 : f32 to vector<16x128xf32>
    %29 = arith.mulf %28, %27 : vector<16x128xf32>
    %30 = arith.addf %24, %29 : vector<16x128xf32>
    %c5 = arith.constant 5 : index
    %31 = memref.load %arg1[%c5] : memref<16xf32, #tpu.memory_space<smem>>
    %c5_17 = arith.constant 5 : index
    %c0_18 = arith.constant 0 : index
    %c0_19 = arith.constant 0 : index
    %32 = vector.load %arg2[%c5_17, %c0_18, %c0_19] : memref<16x16x128xf32, #tpu.memory_space<vmem>>, vector<1x16x128xf32>
    %33 = vector.shape_cast %32 : vector<1x16x128xf32> to vector<16x128xf32>
    %34 = vector.broadcast %31 : f32 to vector<16x128xf32>
    %35 = arith.mulf %34, %33 : vector<16x128xf32>
    %36 = arith.addf %30, %35 : vector<16x128xf32>
    %c6 = arith.constant 6 : index
    %37 = memref.load %arg1[%c6] : memref<16xf32, #tpu.memory_space<smem>>
    %c6_20 = arith.constant 6 : index
    %c0_21 = arith.constant 0 : index
    %c0_22 = arith.constant 0 : index
    %38 = vector.load %arg2[%c6_20, %c0_21, %c0_22] : memref<16x16x128xf32, #tpu.memory_space<vmem>>, vector<1x16x128xf32>
    %39 = vector.shape_cast %38 : vector<1x16x128xf32> to vector<16x128xf32>
    %40 = vector.broadcast %37 : f32 to vector<16x128xf32>
    %41 = arith.mulf %40, %39 : vector<16x128xf32>
    %42 = arith.addf %36, %41 : vector<16x128xf32>
    %c7 = arith.constant 7 : index
    %43 = memref.load %arg1[%c7] : memref<16xf32, #tpu.memory_space<smem>>
    %c7_23 = arith.constant 7 : index
    %c0_24 = arith.constant 0 : index
    %c0_25 = arith.constant 0 : index
    %44 = vector.load %arg2[%c7_23, %c0_24, %c0_25] : memref<16x16x128xf32, #tpu.memory_space<vmem>>, vector<1x16x128xf32>
    %45 = vector.shape_cast %44 : vector<1x16x128xf32> to vector<16x128xf32>
    %46 = vector.broadcast %43 : f32 to vector<16x128xf32>
    %47 = arith.mulf %46, %45 : vector<16x128xf32>
    %48 = arith.addf %42, %47 : vector<16x128xf32>
    %c8 = arith.constant 8 : index
    %49 = memref.load %arg1[%c8] : memref<16xf32, #tpu.memory_space<smem>>
    %c8_26 = arith.constant 8 : index
    %c0_27 = arith.constant 0 : index
    %c0_28 = arith.constant 0 : index
    %50 = vector.load %arg2[%c8_26, %c0_27, %c0_28] : memref<16x16x128xf32, #tpu.memory_space<vmem>>, vector<1x16x128xf32>
    %51 = vector.shape_cast %50 : vector<1x16x128xf32> to vector<16x128xf32>
    %52 = vector.broadcast %49 : f32 to vector<16x128xf32>
    %53 = arith.mulf %52, %51 : vector<16x128xf32>
    %54 = arith.addf %48, %53 : vector<16x128xf32>
    %c9 = arith.constant 9 : index
    %55 = memref.load %arg1[%c9] : memref<16xf32, #tpu.memory_space<smem>>
    %c9_29 = arith.constant 9 : index
    %c0_30 = arith.constant 0 : index
    %c0_31 = arith.constant 0 : index
    %56 = vector.load %arg2[%c9_29, %c0_30, %c0_31] : memref<16x16x128xf32, #tpu.memory_space<vmem>>, vector<1x16x128xf32>
    %57 = vector.shape_cast %56 : vector<1x16x128xf32> to vector<16x128xf32>
    %58 = vector.broadcast %55 : f32 to vector<16x128xf32>
    %59 = arith.mulf %58, %57 : vector<16x128xf32>
    %60 = arith.addf %54, %59 : vector<16x128xf32>
    %c10 = arith.constant 10 : index
    %61 = memref.load %arg1[%c10] : memref<16xf32, #tpu.memory_space<smem>>
    %c10_32 = arith.constant 10 : index
    %c0_33 = arith.constant 0 : index
    %c0_34 = arith.constant 0 : index
    %62 = vector.load %arg2[%c10_32, %c0_33, %c0_34] : memref<16x16x128xf32, #tpu.memory_space<vmem>>, vector<1x16x128xf32>
    %63 = vector.shape_cast %62 : vector<1x16x128xf32> to vector<16x128xf32>
    %64 = vector.broadcast %61 : f32 to vector<16x128xf32>
    %65 = arith.mulf %64, %63 : vector<16x128xf32>
    %66 = arith.addf %60, %65 : vector<16x128xf32>
    %c11 = arith.constant 11 : index
    %67 = memref.load %arg1[%c11] : memref<16xf32, #tpu.memory_space<smem>>
    %c11_35 = arith.constant 11 : index
    %c0_36 = arith.constant 0 : index
    %c0_37 = arith.constant 0 : index
    %68 = vector.load %arg2[%c11_35, %c0_36, %c0_37] : memref<16x16x128xf32, #tpu.memory_space<vmem>>, vector<1x16x128xf32>
    %69 = vector.shape_cast %68 : vector<1x16x128xf32> to vector<16x128xf32>
    %70 = vector.broadcast %67 : f32 to vector<16x128xf32>
    %71 = arith.mulf %70, %69 : vector<16x128xf32>
    %72 = arith.addf %66, %71 : vector<16x128xf32>
    %c12 = arith.constant 12 : index
    %73 = memref.load %arg1[%c12] : memref<16xf32, #tpu.memory_space<smem>>
    %c12_38 = arith.constant 12 : index
    %c0_39 = arith.constant 0 : index
    %c0_40 = arith.constant 0 : index
    %74 = vector.load %arg2[%c12_38, %c0_39, %c0_40] : memref<16x16x128xf32, #tpu.memory_space<vmem>>, vector<1x16x128xf32>
    %75 = vector.shape_cast %74 : vector<1x16x128xf32> to vector<16x128xf32>
    %76 = vector.broadcast %73 : f32 to vector<16x128xf32>
    %77 = arith.mulf %76, %75 : vector<16x128xf32>
    %78 = arith.addf %72, %77 : vector<16x128xf32>
    %c13 = arith.constant 13 : index
    %79 = memref.load %arg1[%c13] : memref<16xf32, #tpu.memory_space<smem>>
    %c13_41 = arith.constant 13 : index
    %c0_42 = arith.constant 0 : index
    %c0_43 = arith.constant 0 : index
    %80 = vector.load %arg2[%c13_41, %c0_42, %c0_43] : memref<16x16x128xf32, #tpu.memory_space<vmem>>, vector<1x16x128xf32>
    %81 = vector.shape_cast %80 : vector<1x16x128xf32> to vector<16x128xf32>
    %82 = vector.broadcast %79 : f32 to vector<16x128xf32>
    %83 = arith.mulf %82, %81 : vector<16x128xf32>
    %84 = arith.addf %78, %83 : vector<16x128xf32>
    %c14 = arith.constant 14 : index
    %85 = memref.load %arg1[%c14] : memref<16xf32, #tpu.memory_space<smem>>
    %c14_44 = arith.constant 14 : index
    %c0_45 = arith.constant 0 : index
    %c0_46 = arith.constant 0 : index
    %86 = vector.load %arg2[%c14_44, %c0_45, %c0_46] : memref<16x16x128xf32, #tpu.memory_space<vmem>>, vector<1x16x128xf32>
    %87 = vector.shape_cast %86 : vector<1x16x128xf32> to vector<16x128xf32>
    %88 = vector.broadcast %85 : f32 to vector<16x128xf32>
    %89 = arith.mulf %88, %87 : vector<16x128xf32>
    %90 = arith.addf %84, %89 : vector<16x128xf32>
    %c15 = arith.constant 15 : index
    %91 = memref.load %arg1[%c15] : memref<16xf32, #tpu.memory_space<smem>>
    %c15_47 = arith.constant 15 : index
    %c0_48 = arith.constant 0 : index
    %c0_49 = arith.constant 0 : index
    %92 = vector.load %arg2[%c15_47, %c0_48, %c0_49] : memref<16x16x128xf32, #tpu.memory_space<vmem>>, vector<1x16x128xf32>
    %93 = vector.shape_cast %92 : vector<1x16x128xf32> to vector<16x128xf32>
    %94 = vector.broadcast %91 : f32 to vector<16x128xf32>
    %95 = arith.mulf %94, %93 : vector<16x128xf32>
    %96 = arith.addf %90, %95 : vector<16x128xf32>
    %cst = arith.constant 0.000000e+00 : f32
    %97 = vector.broadcast %cst : f32 to vector<16x128xf32>
    %98 = arith.subf %97, %96 : vector<16x128xf32>
    %99 = math.exp %98 : vector<16x128xf32>
    %cst_50 = arith.constant 1.000000e+00 : f32
    %100 = vector.broadcast %cst_50 : f32 to vector<16x128xf32>
    %101 = arith.addf %100, %99 : vector<16x128xf32>
    %cst_51 = arith.constant 1.000000e+00 : f32
    %102 = vector.broadcast %cst_51 : f32 to vector<16x128xf32>
    %103 = arith.divf %102, %101 : vector<16x128xf32>
    %104 = arith.mulf %103, %103 : vector<16x128xf32>
    %105 = vector.shape_cast %104 : vector<16x128xf32> to vector<1x16x128xf32>
    %cst_52 = arith.constant dense<0.000000e+00> : vector<1xf32>
    %106 = vector.multi_reduction <add>, %105, %cst_52 [1, 2] : vector<1x16x128xf32> to vector<1xf32>
    %107 = vector.shape_cast %106 : vector<1xf32> to vector<1x1x1xf32>
    %108 = vector.extract %107[0, 0, 0] : f32 from vector<1x1x1xf32>
    %109 = math.sqrt %108 : f32
    %cst_53 = arith.constant 9.99999996E-13 : f32
    %110 = arith.maximumf %109, %cst_53 : f32
    %cst_54 = arith.constant 1.000000e+02 : f32
    %111 = arith.divf %cst_54, %110 : f32
    %112 = vector.broadcast %111 : f32 to vector<16x128xf32>
    %113 = arith.mulf %103, %112 : vector<16x128xf32>
    %c0_55 = arith.constant 0 : index
    %c0_56 = arith.constant 0 : index
    %c0_57 = arith.constant 0 : index
    %114 = vector.load %arg6[%c0_55, %c0_56, %c0_57] : memref<1x16x128xf32, #tpu.memory_space<vmem>>, vector<1x16x128xf32>
    %115 = vector.shape_cast %114 : vector<1x16x128xf32> to vector<16x128xf32>
    %116 = arith.mulf %113, %115 : vector<16x128xf32>
    %cst_58 = arith.constant 0.000000e+00 : f32
    %117 = vector.broadcast %cst_58 : f32 to vector<6x6x128xf32>
    %c0_59 = arith.constant 0 : index
    %c0_60 = arith.constant 0 : index
    %c0_61 = arith.constant 0 : index
    %118 = vector.load %arg8[%c0_59, %c0_60, %c0_61] : memref<6x6x128xf32, #tpu.memory_space<vmem>>, vector<6x6x128xf32>
    tpu.vector_store %arg8[%c0_59, %c0_60, %c0_61], %117 {strides = array<i32>} : memref<6x6x128xf32, #tpu.memory_space<vmem>>, vector<6x6x128xf32>,
    %119 = vector.shape_cast %116 : vector<16x128xf32> to vector<4x4x128xf32>
    %c1_62 = arith.constant 1 : index
    %c1_63 = arith.constant 1 : index
    %c0_64 = arith.constant 0 : index
    %120 = vector.load %arg8[%c1_62, %c1_63, %c0_64] : memref<6x6x128xf32, #tpu.memory_space<vmem>>, vector<4x4x128xf32>
    tpu.vector_store %arg8[%c1_62, %c1_63, %c0_64], %119 {strides = array<i32>} : memref<6x6x128xf32, #tpu.memory_space<vmem>>, vector<4x4x128xf32>,
    %cst_65 = arith.constant 0.000000e+00 : f32
    %121 = vector.broadcast %cst_65 : f32 to vector<16x256xf32>
    %c0_66 = arith.constant 0 : index
    %c0_67 = arith.constant 0 : index
    %c0_68 = arith.constant 0 : index
    %122 = vector.load %arg8[%c0_66, %c0_67, %c0_68] : memref<6x6x128xf32, #tpu.memory_space<vmem>>, vector<4x4x128xf32>
    %123 = vector.shape_cast %122 : vector<4x4x128xf32> to vector<16x128xf32>
    %c0_69 = arith.constant 0 : index
    %c0_70 = arith.constant 0 : index
    %124 = vector.load %arg4[%c0_69, %c0_70] : memref<1152x256xf32, #tpu.memory_space<vmem>>, vector<128x256xf32>
    %cst_71 = arith.constant dense<0.000000e+00> : vector<16x256xf32>
    %125 = tpu.matmul %123, %124, %cst_71 {dimension_numbers = #tpu.dot_dimension_numbers<[1], [0], [0], [1], [0, 0, 1, 1], [], []>} : vector<16x128xf32>, vector<128x256xf32>, vector<16x256xf32> -> vector<16x256xf32>
    %126 = arith.addf %121, %125 : vector<16x256xf32>
    %c0_72 = arith.constant 0 : index
    %c1_73 = arith.constant 1 : index
    %c0_74 = arith.constant 0 : index
    %127 = vector.load %arg8[%c0_72, %c1_73, %c0_74] : memref<6x6x128xf32, #tpu.memory_space<vmem>>, vector<4x4x128xf32>
    %128 = vector.shape_cast %127 : vector<4x4x128xf32> to vector<16x128xf32>
    %c128 = arith.constant 128 : index
    %c0_75 = arith.constant 0 : index
    %129 = vector.load %arg4[%c128, %c0_75] : memref<1152x256xf32, #tpu.memory_space<vmem>>, vector<128x256xf32>
    %cst_76 = arith.constant dense<0.000000e+00> : vector<16x256xf32>
    %130 = tpu.matmul %128, %129, %cst_76 {dimension_numbers = #tpu.dot_dimension_numbers<[1], [0], [0], [1], [0, 0, 1, 1], [], []>} : vector<16x128xf32>, vector<128x256xf32>, vector<16x256xf32> -> vector<16x256xf32>
    %131 = arith.addf %126, %130 : vector<16x256xf32>
    %c0_77 = arith.constant 0 : index
    %c2_78 = arith.constant 2 : index
    %c0_79 = arith.constant 0 : index
    %132 = vector.load %arg8[%c0_77, %c2_78, %c0_79] : memref<6x6x128xf32, #tpu.memory_space<vmem>>, vector<4x4x128xf32>
    %133 = vector.shape_cast %132 : vector<4x4x128xf32> to vector<16x128xf32>
    %c256 = arith.constant 256 : index
    %c0_80 = arith.constant 0 : index
    %134 = vector.load %arg4[%c256, %c0_80] : memref<1152x256xf32, #tpu.memory_space<vmem>>, vector<128x256xf32>
    %cst_81 = arith.constant dense<0.000000e+00> : vector<16x256xf32>
    %135 = tpu.matmul %133, %134, %cst_81 {dimension_numbers = #tpu.dot_dimension_numbers<[1], [0], [0], [1], [0, 0, 1, 1], [], []>} : vector<16x128xf32>, vector<128x256xf32>, vector<16x256xf32> -> vector<16x256xf32>
    %136 = arith.addf %131, %135 : vector<16x256xf32>
    %c1_82 = arith.constant 1 : index
    %c0_83 = arith.constant 0 : index
    %c0_84 = arith.constant 0 : index
    %137 = vector.load %arg8[%c1_82, %c0_83, %c0_84] : memref<6x6x128xf32, #tpu.memory_space<vmem>>, vector<4x4x128xf32>
    %138 = vector.shape_cast %137 : vector<4x4x128xf32> to vector<16x128xf32>
    %c384 = arith.constant 384 : index
    %c0_85 = arith.constant 0 : index
    %139 = vector.load %arg4[%c384, %c0_85] : memref<1152x256xf32, #tpu.memory_space<vmem>>, vector<128x256xf32>
    %cst_86 = arith.constant dense<0.000000e+00> : vector<16x256xf32>
    %140 = tpu.matmul %138, %139, %cst_86 {dimension_numbers = #tpu.dot_dimension_numbers<[1], [0], [0], [1], [0, 0, 1, 1], [], []>} : vector<16x128xf32>, vector<128x256xf32>, vector<16x256xf32> -> vector<16x256xf32>
    %141 = arith.addf %136, %140 : vector<16x256xf32>
    %c1_87 = arith.constant 1 : index
    %c1_88 = arith.constant 1 : index
    %c0_89 = arith.constant 0 : index
    %142 = vector.load %arg8[%c1_87, %c1_88, %c0_89] : memref<6x6x128xf32, #tpu.memory_space<vmem>>, vector<4x4x128xf32>
    %143 = vector.shape_cast %142 : vector<4x4x128xf32> to vector<16x128xf32>
    %c512 = arith.constant 512 : index
    %c0_90 = arith.constant 0 : index
    %144 = vector.load %arg4[%c512, %c0_90] : memref<1152x256xf32, #tpu.memory_space<vmem>>, vector<128x256xf32>
    %cst_91 = arith.constant dense<0.000000e+00> : vector<16x256xf32>
    %145 = tpu.matmul %143, %144, %cst_91 {dimension_numbers = #tpu.dot_dimension_numbers<[1], [0], [0], [1], [0, 0, 1, 1], [], []>} : vector<16x128xf32>, vector<128x256xf32>, vector<16x256xf32> -> vector<16x256xf32>
    %146 = arith.addf %141, %145 : vector<16x256xf32>
    %c1_92 = arith.constant 1 : index
    %c2_93 = arith.constant 2 : index
    %c0_94 = arith.constant 0 : index
    %147 = vector.load %arg8[%c1_92, %c2_93, %c0_94] : memref<6x6x128xf32, #tpu.memory_space<vmem>>, vector<4x4x128xf32>
    %148 = vector.shape_cast %147 : vector<4x4x128xf32> to vector<16x128xf32>
    %c640 = arith.constant 640 : index
    %c0_95 = arith.constant 0 : index
    %149 = vector.load %arg4[%c640, %c0_95] : memref<1152x256xf32, #tpu.memory_space<vmem>>, vector<128x256xf32>
    %cst_96 = arith.constant dense<0.000000e+00> : vector<16x256xf32>
    %150 = tpu.matmul %148, %149, %cst_96 {dimension_numbers = #tpu.dot_dimension_numbers<[1], [0], [0], [1], [0, 0, 1, 1], [], []>} : vector<16x128xf32>, vector<128x256xf32>, vector<16x256xf32> -> vector<16x256xf32>
    %151 = arith.addf %146, %150 : vector<16x256xf32>
    %c2_97 = arith.constant 2 : index
    %c0_98 = arith.constant 0 : index
    %c0_99 = arith.constant 0 : index
    %152 = vector.load %arg8[%c2_97, %c0_98, %c0_99] : memref<6x6x128xf32, #tpu.memory_space<vmem>>, vector<4x4x128xf32>
    %153 = vector.shape_cast %152 : vector<4x4x128xf32> to vector<16x128xf32>
    %c768 = arith.constant 768 : index
    %c0_100 = arith.constant 0 : index
    %154 = vector.load %arg4[%c768, %c0_100] : memref<1152x256xf32, #tpu.memory_space<vmem>>, vector<128x256xf32>
    %cst_101 = arith.constant dense<0.000000e+00> : vector<16x256xf32>
    %155 = tpu.matmul %153, %154, %cst_101 {dimension_numbers = #tpu.dot_dimension_numbers<[1], [0], [0], [1], [0, 0, 1, 1], [], []>} : vector<16x128xf32>, vector<128x256xf32>, vector<16x256xf32> -> vector<16x256xf32>
    %156 = arith.addf %151, %155 : vector<16x256xf32>
    %c2_102 = arith.constant 2 : index
    %c1_103 = arith.constant 1 : index
    %c0_104 = arith.constant 0 : index
    %157 = vector.load %arg8[%c2_102, %c1_103, %c0_104] : memref<6x6x128xf32, #tpu.memory_space<vmem>>, vector<4x4x128xf32>
    %158 = vector.shape_cast %157 : vector<4x4x128xf32> to vector<16x128xf32>
    %c896 = arith.constant 896 : index
    %c0_105 = arith.constant 0 : index
    %159 = vector.load %arg4[%c896, %c0_105] : memref<1152x256xf32, #tpu.memory_space<vmem>>, vector<128x256xf32>
    %cst_106 = arith.constant dense<0.000000e+00> : vector<16x256xf32>
    %160 = tpu.matmul %158, %159, %cst_106 {dimension_numbers = #tpu.dot_dimension_numbers<[1], [0], [0], [1], [0, 0, 1, 1], [], []>} : vector<16x128xf32>, vector<128x256xf32>, vector<16x256xf32> -> vector<16x256xf32>
    %161 = arith.addf %156, %160 : vector<16x256xf32>
    %c2_107 = arith.constant 2 : index
    %c2_108 = arith.constant 2 : index
    %c0_109 = arith.constant 0 : index
    %162 = vector.load %arg8[%c2_107, %c2_108, %c0_109] : memref<6x6x128xf32, #tpu.memory_space<vmem>>, vector<4x4x128xf32>
    %163 = vector.shape_cast %162 : vector<4x4x128xf32> to vector<16x128xf32>
    %c1024 = arith.constant 1024 : index
    %c0_110 = arith.constant 0 : index
    %164 = vector.load %arg4[%c1024, %c0_110] : memref<1152x256xf32, #tpu.memory_space<vmem>>, vector<128x256xf32>
    %cst_111 = arith.constant dense<0.000000e+00> : vector<16x256xf32>
    %165 = tpu.matmul %163, %164, %cst_111 {dimension_numbers = #tpu.dot_dimension_numbers<[1], [0], [0], [1], [0, 0, 1, 1], [], []>} : vector<16x128xf32>, vector<128x256xf32>, vector<16x256xf32> -> vector<16x256xf32>
    %166 = arith.addf %161, %165 : vector<16x256xf32>
    %c0_112 = arith.constant 0 : index
    %c0_113 = arith.constant 0 : index
    %167 = vector.load %arg5[%c0_112, %c0_113] : memref<1x256xf32, #tpu.memory_space<vmem>>, vector<1x256xf32>
    %168 = vector.broadcast %167 : vector<1x256xf32> to vector<16x256xf32>
    %169 = arith.addf %166, %168 : vector<16x256xf32>
    %c0_114 = arith.constant 0 : index
    %c0_115 = arith.constant 0 : index
    %c0_116 = arith.constant 0 : index
    %170 = vector.load %arg7[%c0_114, %c0_115, %c0_116] : memref<1x16x256xf32, #tpu.memory_space<vmem>>, vector<1x16x256xf32>
    %171 = vector.shape_cast %170 : vector<1x16x256xf32> to vector<16x256xf32>
    %172 = vector.shape_cast %169 : vector<16x256xf32> to vector<1x16x256xf32>
    tpu.vector_store %arg7[%c0_114, %c0_115, %c0_116], %172 {strides = array<i32>} : memref<1x16x256xf32, #tpu.memory_space<vmem>>, vector<1x16x256xf32>,
    return
  }
  func.func @transform_0(%arg0: i32) -> i32 {
    %c0_i32 = arith.constant 0 : i32
    %c0_i32_0 = arith.constant 0 : i32
    return %c0_i32 : i32
  }
  func.func @transform_1(%arg0: i32) -> (i32, i32, i32) {
    %c0_i32 = arith.constant 0 : i32
    %c0_i32_0 = arith.constant 0 : i32
    %c0_i32_1 = arith.constant 0 : i32
    %c0_i32_2 = arith.constant 0 : i32
    return %c0_i32, %c0_i32_0, %c0_i32_1 : i32, i32, i32
  }
  func.func @transform_2(%arg0: i32) -> (i32, i32) {
    %c0_i32 = arith.constant 0 : i32
    %c0_i32_0 = arith.constant 0 : i32
    %c0_i32_1 = arith.constant 0 : i32
    return %c0_i32, %c0_i32_0 : i32, i32
  }
  func.func @transform_3(%arg0: i32) -> (i32, i32) {
    %c0_i32 = arith.constant 0 : i32
    %c0_i32_0 = arith.constant 0 : i32
    %c0_i32_1 = arith.constant 0 : i32
    return %c0_i32, %c0_i32_0 : i32, i32
  }
  func.func @transform_4(%arg0: i32) -> (i32, i32) {
    %c0_i32 = arith.constant 0 : i32
    %c0_i32_0 = arith.constant 0 : i32
    %c0_i32_1 = arith.constant 0 : i32
    return %c0_i32, %c0_i32_0 : i32, i32
  }
  func.func @transform_5(%arg0: i32) -> (i32, i32, i32) {
    %c0_i32 = arith.constant 0 : i32
    %c0_i32_0 = arith.constant 0 : i32
    %c0_i32_1 = arith.constant 0 : i32
    return %arg0, %c0_i32, %c0_i32_0 : i32, i32, i32
  }
  func.func @transform_6(%arg0: i32) -> (i32, i32, i32) {
    %c0_i32 = arith.constant 0 : i32
    %c0_i32_0 = arith.constant 0 : i32
    %c0_i32_1 = arith.constant 0 : i32
    return %arg0, %c0_i32, %c0_i32_0 : i32, i32, i32
  }
}

</mosaic_0001>

<bundles_post_ra>
// kernel: tpu_custom_call.1
= control target key start
LH: loop header
LB: loop body
LE: loop exit
PB: predicated region body
PF: predicated region fallthrough
CT: control target
= control target key end

     0   :  { %11 = vsyncpa [#allocation6], 0  ;;  %s2413_s0 = inlined_call_operand.hbm [shape: f32[16], index: 0, kind: input, shape index: {}]   ;;  %s2414_s1 = inlined_call_operand.hbm [shape: f32[16,16,128], index: 1, kind: input, shape index: {}]   ;;  %s2415_s2 = inlined_call_operand.hbm [shape: f32[16,128], index: 2, kind: input, shape index: {}]   ;;  %s2416_s3 = inlined_call_operand.hbm [shape: f32[1152,256], index: 3, kind: input, shape index: {}]   ;;  %s2417_s4 = inlined_call_operand.hbm [shape: f32[1,256], index: 4, kind: input, shape index: {}]   ;;  %s2418_s5 = inlined_call_operand.hbm [shape: f32[2,16,128], index: 5, kind: input, shape index: {}]   ;;  %s2419_s6 = inlined_call_operand.hbm [shape: f32[2,16,256], index: 6, kind: output, shape index: {}]  }
   0x1   :  { %12 = vsyncpa [#allocation4], 0 }
   0x2   :  { %13 = vsyncpa [#allocation9], 0 }
   0x3   :  { %14 = vsyncpa [#allocation12], 0 }
   0x4   :  { %15 = vsyncpa [#allocation5], 0 }
   0x5   :  { %17 = vsyncpa [#allocation5 + $0x1], 0  ;;  %s2147_s21 = smov 0   ;;  %s2149_s22 = smov 0  }
   0x6   :  { %s2151_s23 = smov 0   ;;  %s2153_s24 = smov 0  }
   0x7 LB: > { %s2168_s25 = sadd.s32 4294967295, %s2097_s24   ;;  %s1654_s26 = sadd.s32 4294967294, %s2097_s24   ;;  %s2097_s24 = sphi %s2153_s24, %s2434_s24   ;;  %s2093_s23 = sphi %s2151_s23, %s2433_s23   ;;  %s2089_s22 = sphi %s2149_s22, %s2432_s22   ;;  %s2085_s21 = sphi %s2147_s21, %s2431_s21  }
   0x8   : > { %p148_p0 = scmp.ne.s32.totalorder %s2089_s22, %s2085_s21  ;;  %p149_p1 = scmp.eq.s32.totalorder %s2168_s25, 0 }
   0x9   : > { %p172_p2 = scmp.eq.s32.totalorder %s2168_s25, 1  ;;  %p178_p3 = scmp.eq.s32.totalorder %s1654_s26, 1 }
   0xa   : > { %p2177_p4 = por %p149_p1, %p148_p0  ;;  %p1655_p5 = scmp.ge.s32.totalorder %s2097_s24, 1 }
   0xb   : > { %p2182_p6 = por %p178_p3, %p148_p0  ;;  %p185_p7 = scmp.lt.s32.totalorder %s2097_s24, 3 }
   0xc   : > { %s206_s7 = sshll.u32 %s2414_s1, 4  ;;  %s2099_s9 = smov [#allocation7]   ;;  %s207_s7 = int_to_ptr.hbm [resolvable:$true] %s206_s7 }
   0xd   : > { %p2190_p8 = pnand %p1655_p5, %p185_p7  ;;  %s208_s10 = sshll.u32 %s2099_s9, 4  ;;  %s209_s10 = int_to_ptr.vmem [resolvable:$true] %s208_s10 }
   0xe   : > { %s220_s14 = sshll.u32 %s2415_s2, 4  ;;  %s2420_s15 = smov 128   ;;  %s221_s14 = int_to_ptr.hbm [resolvable:$true] %s220_s14 }
   0xf   : > { %p1757_p9 = pneg %p2190_p8  ;;  %s2421_s16 = smov 8  }
  0x10   : > { %s2102_s17 = smov [#allocation8]   ;;  %s197_s26 = sshll.u32 %s2413_s0, 4  ;;  %s198_s26 = int_to_ptr.hbm [resolvable:$true] %s197_s26 }
  0x11   : > { %p2198_p10 = pnand %p1757_p9, %p149_p1  ;;  %s222_s18 = sshll.u32 %s2102_s17, 4  ;;  %s223_s18 = int_to_ptr.vmem [resolvable:$true] %s222_s18 }
  0x12   : > { %s234_s9 = sshll.u32 %s2416_s3, 4  ;;  %s2105_s13 = smov 256   ;;  %s235_s9 = int_to_ptr.hbm [resolvable:$true] %s234_s9 }
  0x13   : > { %1763 = dma.hbm_to_vmem [thread:$0]  (!%p2198_p10), %s207_s7, 4096, %s209_s10, [#allocation4], %s2420_s15, %s2420_s15, %s2421_s16  }
  0x14   : > { %1766 = dma.hbm_to_vmem [thread:$0]  (!%p2198_p10), %s221_s14, 256, %s223_s18, [#allocation9], %s2420_s15, %s2420_s15, %s2421_s16  }
  0x15   : > { %s2103_s7 = smov [#allocation3]   ;;  %s2104_s10 = smov [#allocation10]  }
  0x16   : > { %1760 = dma.hbm_to_smem (!%p2198_p10), %s198_s26, 16, %s2103_s7, [#allocation6]  }
  0x17   : > { %s236_s12 = sshll.u32 %s2104_s10, 4  ;;  %s2106_s14 = smov 16   ;;  %s237_s12 = int_to_ptr.vmem [resolvable:$true] %s236_s12 }
  0x18   : > { %1769 = dma.hbm_to_vmem [thread:$0]  (!%p2198_p10), %s235_s9, 36864, %s237_s12, [#allocation9], %s2105_s13, %s2105_s13, %s2106_s14  }
  0x19   : > { %s249_s19 = sshll.u32 %s2417_s4, 4  ;;  %s2107_s20 = smov [#allocation11]   ;;  %s250_s19 = int_to_ptr.hbm [resolvable:$true] %s249_s19 }
  0x1a   : > { %s251_s26 = sshll.u32 %s2107_s20, 4  ;;  %s2232_s29 = sadd.s32 1, %s2097_s24   ;;  %s252_s26 = int_to_ptr.vmem [resolvable:$true] %s251_s26 }
  0x1b   : > { %1772 = dma.hbm_to_vmem [thread:$0]  (!%p2198_p10), %s250_s19, 32, %s252_s26, [#allocation12]  }
  0x1c   : > { %s132_s30 = ssub.s32 %s2097_s24, %s2232_s29  ;;  %s135_s7 = sadd.s32 1, %s2093_s23 }
  0x1d   : > { %p133_p12 = scmp.eq.s32.totalorder %s132_s30, 0  ;;  %p142_p13 = scmp.ne.s32.totalorder %s2093_s23, %s2089_s22 }
  0x1e   : > { %p143_p0 = scmp.eq.s32.totalorder %s2097_s24, 0  ;;  %p1786_p3 = scmp.lt.s32.totalorder %s2097_s24, 2 }
  0x1f   : > { %s2242_s9 = scalar_select %p133_p12, %s2093_s23, %s135_s7  }
  0x20   : > { %p144_p5 = por %p143_p0, %p142_p13  ;;  %p2246_p7 = por %p172_p2, %p142_p13 }
  0x21   : > { %s262_s11 = sand.u32 1, %s2097_s24   ;;  %s264_s12 = sand.u32 1, %s2093_s23  }
  0x22   : > { %s1662_s13 = sshll.u32 %s264_s12, 4  ;;  %s1693_s14 = sshll.u32 %s2097_s24, 4 }
  0x23   : > { %s271_s19 = scalar_lea.hbm %s2418_s5, %s1693_s14  ;;  %s266_s20 = scalar_lea.vmem [#allocation13], %s1662_s13 }
  0x24   : > { %s274_s26 = sshll.u32 %s266_s20, 4  ;;  %s272_s30 = sshll.u32 %s271_s19, 4  ;;  %s275_s26 = int_to_ptr.vmem [resolvable:$true] %s274_s26  ;;  %s273_s30 = int_to_ptr.hbm [resolvable:$true] %s272_s30 }
  0x25   : > { %p2258_p9 = pnand %p1786_p3, %p144_p5  ;;  %s263_s15 = scalar_lea.sflag [#allocation4], %s262_s11 }
  0x26   : > { %s1985_s16 = sshra.s32 %s273_s30, 4  ;;  %s1992_s17 = scalar_lea.hbm %s2418_s5, 32  ;;  %s1986_s16 = int_to_ptr.hbm [resolvable:$true] %s1985_s16 }
  0x27   : > { %s1987_s12 = scalar_lea.hbm %s1986_s16, 16  ;;  %p1989_p10 = pneg %p2258_p9 }
  0x28   : > { %p1988_p2 = scmp.ne.s32.totalorder %s1986_s16, %s1987_s12  ;;  %p1993_p0 = scmp.lt.s32.totalorder %s1986_s16, %s2418_s5 }
  0x29   : > { %p1994_p3 = scmp.lt.s32.totalorder %s1992_s17, %s1987_s12 }
  0x2a   : > { %p1990_p12 = pnand %p1989_p10, %p1988_p2 }
  0x2b   : > { %p1995_p5 = por %p1994_p3, %p1993_p0 }
  0x2c   : > { %p1991_p13 = pneg %p1990_p12 }
  0x2e   : > { %p1996_p11 = pnand %p1995_p5, %p1991_p13 }
  0x30   : > { %1999 = shalt.err (!%p1996_p11)
}
  0x31   : > { %s2428_s11 = smov 8   ;;  %s2429_s20 = smov 128  }
  0x32   : > { %1776 = dma.hbm_to_vmem [thread:$0]  (!%p2258_p9), %s273_s30, 256, %s275_s26, %s263_s15, %s2429_s20, %s2429_s20, %s2428_s11  }
  0x33   : > { %286 = sbr.rel (%p2190_p8) target bundleno = 747 (0x2eb), region = 44 }
  0x38   : > { %2060 = dma.done.wait (%p149_p1), [#allocation6], 16  }
  0x39   : > { %2062 = vsyncadd (%p149_p1), [#allocation6], 4294967280 }
  0x3a   : > { %2064 = dma.done.wait (%p149_p1), [#allocation4], 4096  }
  0x3b   : > { %2066 = vsyncadd (%p149_p1), [#allocation4], 4294963200 }
  0x3c   : > { %2068 = dma.done.wait (%p149_p1), [#allocation9], 37120  }
  0x3d   : > { %2070 = vsyncadd (%p149_p1), [#allocation9], 4294930176 }
  0x3e   : > { %2072 = dma.done.wait (%p149_p1), [#allocation12], 32  }
  0x3f   : > { %2074 = vsyncadd (%p149_p1), [#allocation12], 4294967264  ;;  %s313_s8 = sand.u32 1, %s2168_s25   ;;  %s2295_s15 = sand.u32 1, %s2089_s22  }
  0x40   : > { %s1671_s16 = sshll.u32 %s2295_s15, 4  ;;  %s314_s26 = scalar_lea.sflag [#allocation4], %s313_s8 }
  0x41   : > { %s2298_s30 = scalar_lea.vmem [#allocation13], %s1671_s16 }
  0x42   : > { %2076 = dma.done.wait (%p2177_p4), %s314_s26, 256  }
  0x43   : > { %2078 = vsyncadd (%p2177_p4), %s314_s26, 4294967040 }
  0x44   : > { %323 = sfence }
  0x45   : > { %s350_s7 = sld [smem:[#allocation3]]  ;;  %v351_v0 = vld [vmem:[#allocation7] sm:$0xff]  ;;  %v352_v1 = vld [vmem:[#allocation7 + $0x8] sm:$0xff]  ;;  %v360_v3 = vld [vmem:[#allocation7 + $0x10] sm:$0xff] }
  0x46   : > { %s1673_s12 = sld [smem:[#allocation3 + $0x1]]  ;;  %v348_v2 = vld [vmem:[#allocation8] sm:$0xff]  ;;  %v361_v4 = vld [vmem:[#allocation7 + $0x18] sm:$0xff]  ;;  %v349_v5 = vld [vmem:[#allocation8 + $0x8] sm:$0xff] }
  0x47   : > { %s1674_s13 = sld [smem:[#allocation3 + $0x2]]  ;;  %v369_v7 = vld [vmem:[#allocation7 + $0x20] sm:$0xff]  ;;  %v370_v8 = vld [vmem:[#allocation7 + $0x28] sm:$0xff]  ;;  %v378_v15 = vld [vmem:[#allocation7 + $0x30] sm:$0xff] }
  0x48   : > { %s2304_s14 = sld [smem:[#allocation3 + $0x3]]  ;;  %v379_v16 = vld [vmem:[#allocation7 + $0x38] sm:$0xff]  ;;  %v387_v22 = vld [vmem:[#allocation7 + $0x40] sm:$0xff]  ;;  %v388_v23 = vld [vmem:[#allocation7 + $0x48] sm:$0xff] }
  0x49   : > { %s2306_s17 = sld [smem:[#allocation3 + $0x4]]  ;;  %v396_v29 = vld [vmem:[#allocation7 + $0x50] sm:$0xff]  ;;  %v397_v30 = vld [vmem:[#allocation7 + $0x58] sm:$0xff]  ;;  %v405_v36 = vld [vmem:[#allocation7 + $0x60] sm:$0xff] }
  0x4a   : > { %s2308_s18 = sld [smem:[#allocation3 + $0x5]]  ;;  %v406_v37 = vld [vmem:[#allocation7 + $0x68] sm:$0xff]  ;;  %v414_v43 = vld [vmem:[#allocation7 + $0x70] sm:$0xff]  ;;  %v415_v44 = vld [vmem:[#allocation7 + $0x78] sm:$0xff] }
  0x4b   : > { %v353_v6 = vstv %s350_s7  ;;  %s2310_s27 = sld [smem:[#allocation3 + $0x6]]  ;;  %v423_v50 = vld [vmem:[#allocation7 + $0x80] sm:$0xff]  ;;  %v424_v51 = vld [vmem:[#allocation7 + $0x88] sm:$0xff]  ;;  %v432_v57 = vld [vmem:[#allocation7 + $0x90] sm:$0xff] }
  0x4c   : > { %v354_v9 = vmul.f32 %v353_v6, %v351_v0  ;;  %v355_v10 = vmul.f32 %v353_v6, %v352_v1  ;;  %v362_v11 = vstv %s1673_s12  ;;  %s2312_s19 = sld [smem:[#allocation3 + $0x7]]  ;;  %v433_v58 = vld [vmem:[#allocation7 + $0x98] sm:$0xff]  ;;  %v441_v0 = vld [vmem:[#allocation7 + $0xa0] sm:$0xff]  ;;  %v442_v1 = vld [vmem:[#allocation7 + $0xa8] sm:$0xff] }
  0x4d   : > { %v363_v12 = vmul.f32 %v362_v11, %v360_v3  ;;  %v364_v13 = vmul.f32 %v362_v11, %v361_v4  ;;  %v371_v14 = vstv %s1674_s13  ;;  %s2316_s11 = sld [smem:[#allocation3 + $0x8]] }
  0x4e   : > { %v356_v17 = vadd.f32 %v354_v9, %v348_v2  ;;  %v357_v18 = vadd.f32 %v355_v10, %v349_v5  ;;  %v372_v19 = vmul.f32 %v371_v14, %v369_v7  ;;  %v373_v20 = vmul.f32 %v371_v14, %v370_v8  ;;  %s2319_s20 = sld [smem:[#allocation3 + $0x9]]  ;;  %v450_v7 = vld [vmem:[#allocation7 + $0xb0] sm:$0xff]  ;;  %v451_v8 = vld [vmem:[#allocation7 + $0xb8] sm:$0xff]  ;;  %v459_v14 = vld [vmem:[#allocation7 + $0xc0] sm:$0xff] }
  0x4f   : > { %v380_v21 = vstv %s2304_s14  ;;  %v389_v24 = vstv %s2306_s17  ;;  %s2322_s8 = sld [smem:[#allocation3 + $0xa]] }
  0x50   : > { %v365_v25 = vadd.f32 %v363_v12, %v356_v17  ;;  %v366_v26 = vadd.f32 %v364_v13, %v357_v18  ;;  %v381_v27 = vmul.f32 %v380_v21, %v378_v15  ;;  %v382_v28 = vmul.f32 %v380_v21, %v379_v16  ;;  %s2325_s16 = sld [smem:[#allocation3 + $0xb]]  ;;  %v460_v15 = vld [vmem:[#allocation7 + $0xc8] sm:$0xff]  ;;  %v468_v21 = vld [vmem:[#allocation7 + $0xd0] sm:$0xff] }
  0x51   : > { %v398_v31 = vstv %s2308_s18  ;;  %v390_v34 = vmul.f32 %v389_v24, %v387_v22  ;;  %v391_v35 = vmul.f32 %v389_v24, %v388_v23  ;;  %v407_v38 = vstv %s2310_s27  ;;  %s2328_s26 = sld [smem:[#allocation3 + $0xc]]  ;;  %v469_v22 = vld [vmem:[#allocation7 + $0xd8] sm:$0xff]  ;;  %s2108_s18 = smov 1e-12  }
  0x52   : > { %v374_v32 = vadd.f32 %v372_v19, %v365_v25  ;;  %v375_v33 = vadd.f32 %v373_v20, %v366_v26  ;;  %v399_v41 = vmul.f32 %v398_v31, %v396_v29  ;;  %v400_v42 = vmul.f32 %v398_v31, %v397_v30  ;;  %s2331_s7 = sld [smem:[#allocation3 + $0xd]]  ;;  %v478_v29 = vld [vmem:[#allocation7 + $0xe8] sm:$0xff] }
  0x53   : > { %v416_v45 = vstv %s2312_s19  ;;  %v408_v48 = vmul.f32 %v407_v38, %v405_v36  ;;  %v409_v49 = vmul.f32 %v407_v38, %v406_v37  ;;  %v425_v52 = vstv %s2316_s11  ;;  %s2334_s12 = sld [smem:[#allocation3 + $0xe]]  ;;  %v487_v36 = vld [vmem:[#allocation7 + $0xf8] sm:$0xff] }
  0x54   : > { %v383_v39 = vadd.f32 %v381_v27, %v374_v32  ;;  %v384_v40 = vadd.f32 %v382_v28, %v375_v33  ;;  %v417_v55 = vmul.f32 %v416_v45, %v414_v43  ;;  %v418_v56 = vmul.f32 %v416_v45, %v415_v44  ;;  %s2337_s13 = sld [smem:[#allocation3 + $0xf]]  ;;  %v477_v28 = vld [vmem:[#allocation7 + $0xe0] sm:$0xff] }
  0x55   : > { %v434_v59 = vstv %s2319_s20  ;;  %v426_v62 = vmul.f32 %v425_v52, %v423_v50  ;;  %v427_v63 = vmul.f32 %v425_v52, %v424_v51  ;;  %v443_v2 = vstv %s2322_s8  ;;  %s1694_s8 = sshll.u32 %s2168_s25, 5  ;;  %s1516_s25 = scalar_lea.sflag [#allocation5], %s2295_s15 }
  0x56   : > { %v392_v46 = vadd.f32 %v390_v34, %v383_v39  ;;  %v393_v47 = vadd.f32 %v391_v35, %v384_v40  ;;  %v435_v5 = vmul.f32 %v434_v59, %v432_v57  ;;  %v436_v6 = vmul.f32 %v434_v59, %v433_v58  ;;  %v486_v35 = vld [vmem:[#allocation7 + $0xf0] sm:$0xff] }
  0x57   : > { %v452_v9 = vstv %s2325_s16  ;;  %v444_v12 = vmul.f32 %v443_v2, %v441_v0  ;;  %v445_v13 = vmul.f32 %v443_v2, %v442_v1  ;;  %v461_v16 = vstv %s2328_s26 }
  0x58   : > { %v401_v53 = vadd.f32 %v399_v41, %v392_v46  ;;  %v402_v54 = vadd.f32 %v400_v42, %v393_v47  ;;  %v453_v19 = vmul.f32 %v452_v9, %v450_v7  ;;  %v454_v20 = vmul.f32 %v452_v9, %v451_v8 }
  0x59   : > { %v470_v23 = vstv %s2331_s7  ;;  %v462_v26 = vmul.f32 %v461_v16, %v459_v14  ;;  %v463_v27 = vmul.f32 %v461_v16, %v460_v15  ;;  %v479_v30 = vstv %s2334_s12  ;;  %s1527_s7 = scalar_lea.hbm %s2419_s6, %s1694_s8 }
  0x5a   : > { %v410_v60 = vadd.f32 %v408_v48, %v401_v53  ;;  %v411_v61 = vadd.f32 %v409_v49, %v402_v54  ;;  %v471_v33 = vmul.f32 %v470_v23, %v468_v21  ;;  %v472_v34 = vmul.f32 %v470_v23, %v469_v22 }
  0x5b   : > { %v488_v37 = vstv %s2337_s13  ;;  %v480_v40 = vmul.f32 %v479_v30, %v477_v28  ;;  %v481_v41 = vmul.f32 %v479_v30, %v478_v29  ;;  %s1530_s13 = sshll.u32 %s1527_s7, 4  ;;  %s1531_s13 = int_to_ptr.hbm [resolvable:$true] %s1530_s13 }
  0x5c   : > { %v419_v3 = vadd.f32 %v417_v55, %v410_v60  ;;  %v420_v4 = vadd.f32 %v418_v56, %v411_v61  ;;  %v489_v44 = vmul.f32 %v488_v37, %v486_v35  ;;  %v490_v45 = vmul.f32 %v488_v37, %v487_v36  ;;  %v669_v35 = vld [vmem:[#allocation10 + $0x1f0] sm:$0xff]  ;;  %v670_v36 = vld [vmem:[#allocation10 + $0x1f8] sm:$0xff]  ;;  %v667_v37 = vld [vmem:[#allocation10 + $0x1e0] sm:$0xff] }
  0x5d   : > { %686 = vmatpush.msra.mxu0 %v669_v35  ;;  %709 = vmatpush.msra.mxu1 %v670_v36  ;;  %v642_v35 = vld [vmem:[#allocation10 + $0x118] sm:$0xff]  ;;  %v607_v36 = vld [vmem:[#allocation10 + $0x20] sm:$0xff] }
  0x5e   : > { %v428_v10 = vadd.f32 %v426_v62, %v419_v3  ;;  %v429_v11 = vadd.f32 %v427_v63, %v420_v4 }
  0x5f   : > { %687 = vmatpush.msra.mxu0 %v667_v37  ;;  %v608_v37 = vld [vmem:[#allocation10 + $0x28] sm:$0xff] }
  0x60   : > { %v437_v17 = vadd.f32 %v435_v5, %v428_v10  ;;  %v438_v18 = vadd.f32 %v436_v6, %v429_v11 }
  0x62   : > { %v446_v24 = vadd.f32 %v444_v12, %v437_v17  ;;  %v447_v25 = vadd.f32 %v445_v13, %v438_v18 }
  0x64   : > { %v455_v31 = vadd.f32 %v453_v19, %v446_v24  ;;  %v456_v32 = vadd.f32 %v454_v20, %v447_v25 }
  0x66   : > { %v464_v38 = vadd.f32 %v462_v26, %v455_v31  ;;  %v465_v39 = vadd.f32 %v463_v27, %v456_v32 }
  0x68   : > { %v473_v42 = vadd.f32 %v471_v33, %v464_v38  ;;  %v474_v43 = vadd.f32 %v472_v34, %v465_v39  ;;  %v668_v38 = vld [vmem:[#allocation10 + $0x1e8] sm:$0xff]  ;;  %v665_v39 = vld [vmem:[#allocation10 + $0x1d0] sm:$0xff] }
  0x69   : > { %710 = vmatpush.msra.mxu1 %v668_v38  ;;  %688 = vmatpush.msra.mxu0 %v665_v39  ;;  %v639_v39 = vld [vmem:[#allocation10 + $0x100] sm:$0xff] }
  0x6a   : > { %v482_v46 = vadd.f32 %v480_v40, %v473_v42  ;;  %v483_v47 = vadd.f32 %v481_v41, %v474_v43  ;;  %v666_v40 = vld [vmem:[#allocation10 + $0x1d8] sm:$0xff]  ;;  %v633_v41 = vld [vmem:[#allocation10 + $0xf0] sm:$0xff]  ;;  %v663_v43 = vld [vmem:[#allocation10 + $0x1c0] sm:$0xff] }
  0x6b   : > { %v634_v42 = vld [vmem:[#allocation10 + $0xf8] sm:$0xff]  ;;  %747 = vmatpush.msra.mxu2 %v633_v41  ;;  %711 = vmatpush.msra.mxu1 %v666_v40  ;;  %v640_v40 = vld [vmem:[#allocation10 + $0x108] sm:$0xff] }
  0x6c   : > { %v491_v48 = vadd.f32 %v489_v44, %v482_v46  ;;  %v492_v49 = vadd.f32 %v490_v45, %v483_v47  ;;  %v664_v44 = vld [vmem:[#allocation10 + $0x1c8] sm:$0xff]  ;;  %770 = vmatpush.msra.mxu3 %v634_v42  ;;  %v631_v45 = vld [vmem:[#allocation10 + $0xe0] sm:$0xff]  ;;  %v661_v46 = vld [vmem:[#allocation10 + $0x1b0] sm:$0xff]  ;;  %689 = vmatpush.msra.mxu0 %v663_v43 }
  0x6d   : > { %v632_v47 = vld [vmem:[#allocation10 + $0xe8] sm:$0xff]  ;;  %748 = vmatpush.msra.mxu2 %v631_v45  ;;  %712 = vmatpush.msra.mxu1 %v664_v44  ;;  %v827_v42 = vld [vmem:[#allocation10 + $0x2f0] sm:$0xff]  ;;  %v828_v43 = vld [vmem:[#allocation10 + $0x2f8] sm:$0xff] }
  0x6e   : > { %v493_v50 = vsub.f32 0.0, %v491_v48  ;;  %v494_v51 = vsub.f32 0.0, %v492_v49  ;;  %v662_v48 = vld [vmem:[#allocation10 + $0x1b8] sm:$0xff]  ;;  %771 = vmatpush.msra.mxu3 %v632_v47  ;;  %v629_v49 = vld [vmem:[#allocation10 + $0xd0] sm:$0xff]  ;;  %690 = vmatpush.msra.mxu0 %v661_v46 }
  0x6f   : > { %749 = vmatpush.msra.mxu2 %v629_v49  ;;  %713 = vmatpush.msra.mxu1 %v662_v48  ;;  %v605_v45 = vld [vmem:[#allocation10 + $0x10] sm:$0xff]  ;;  %v606_v46 = vld [vmem:[#allocation10 + $0x18] sm:$0xff]  ;;  %v825_v48 = vld [vmem:[#allocation10 + $0x2e0] sm:$0xff] }
  0x70   : > { %v495_v52 = vmul.f32 1.442695, %v493_v50  ;;  %v497_v53 = vmul.f32 1.442695, %v494_v51  ;;  %v630_v50 = vld [vmem:[#allocation10 + $0xd8] sm:$0xff]  ;;  %v627_v51 = vld [vmem:[#allocation10 + $0xc0] sm:$0xff] }
  0x71   : > { %772 = vmatpush.msra.mxu3 %v630_v50  ;;  %750 = vmatpush.msra.mxu2 %v627_v51  ;;  %v826_v49 = vld [vmem:[#allocation10 + $0x2e8] sm:$0xff]  ;;  %v823_v50 = vld [vmem:[#allocation10 + $0x2d0] sm:$0xff]  ;;  %v824_v51 = vld [vmem:[#allocation10 + $0x2d8] sm:$0xff] }
  0x72   : > { %1838 = vpow2.f32 %v495_v52  ;;  %v628_v52 = vld [vmem:[#allocation10 + $0xc8] sm:$0xff] }
  0x73   : > { %1840 = vpow2.f32 %v497_v53  ;;  %v659_v53 = vld [vmem:[#allocation10 + $0x1a0] sm:$0xff]  ;;  %773 = vmatpush.msra.mxu3 %v628_v52 }
  0x74   : > { %691 = vmatpush.msra.mxu0 %v659_v53  ;;  %v821_v52 = vld [vmem:[#allocation10 + $0x2c0] sm:$0xff]  ;;  %v822_v53 = vld [vmem:[#allocation10 + $0x2c8] sm:$0xff] }
  0x78   : > { %v1839_v54 = vpop.eup %1838 }
  0x79   : > { %v1841_v55 = vpop.eup %1840  ;;  %v499_v56 = vadd.f32 1.0, %v1839_v54  ;;  %v660_v54 = vld [vmem:[#allocation10 + $0x1a8] sm:$0xff] }
  0x7a   : > { %v500_v57 = vadd.f32 1.0, %v1841_v55  ;;  %v625_v55 = vld [vmem:[#allocation10 + $0xb0] sm:$0xff]  ;;  %714 = vmatpush.msra.mxu1 %v660_v54  ;;  %v2109_v54 = vmov 0.0  }
  0x7b   : > { %1842 = vrcp.f32 %v499_v56  ;;  %vm506_vm0 = vweird.f32 %v499_v56  ;;  %v512_v61 = vand.u32 2147483648, %v499_v56  ;;  %v510_v0 = vand.u32 2147483647, %v499_v56  ;;  %751 = vmatpush.msra.mxu2 %v625_v55  ;;  %582 = vst [vmem:[#allocation2] sm:$0x3f] %v2109_v54  ;;  %v603_v55 = vld [vmem:[#allocation10] sm:$0xff] }
  0x7c   : > { %1844 = vrcp.f32 %v500_v57  ;;  %v527_v1 = vand.u32 2147483648, %v500_v57  ;;  %vm521_vm2 = vweird.f32 %v500_v57  ;;  %v525_v3 = vand.u32 2147483647, %v500_v57  ;;  %583 = vst [vmem:[#allocation2 + $0x8] sm:$0x3f] %v2109_v54 }
  0x7d   : > { %v513_v5 = vor.u32 1.1754944e-38, %v512_v61  ;;  %vm511_vm5 = vcmp.eq.f32.partialorder %v510_v0, 8.507059e+37  ;;  %v655_v61 = vld [vmem:[#allocation10 + $0x180] sm:$0xff]  ;;  %v622_v0 = vld [vmem:[#allocation10 + $0x98] sm:$0xff]  ;;  %584 = vst [vmem:[#allocation2 + $0x10] sm:$0x3f] %v2109_v54 }
  0x7e   : > { %v528_v8 = vor.u32 1.1754944e-38, %v527_v1  ;;  %vm526_vm7 = vcmp.eq.f32.partialorder %v525_v3, 8.507059e+37  ;;  %v654_v3 = vld [vmem:[#allocation10 + $0x178] sm:$0xff]  ;;  %585 = vst [vmem:[#allocation2 + $0x18] sm:$0x3f] %v2109_v54 }
  0x7f   : > { %586 = vst [vmem:[#allocation2 + $0x20] sm:$0x3f] %v2109_v54 }
  0x80   : > { %587 = vst [vmem:[#allocation2 + $0x28] sm:$0x3f] %v2109_v54  ;;  %v903_v54 = vld [vmem:[#allocation10 + $0x328] sm:$0xff] }
  0x81   : > { %v1843_v58 = vpop.eup %1842 }
  0x82   : > { %v1845_v59 = vpop.eup %1844  ;;  %v502_v60 = vmul.f32 %v1843_v58, %v499_v56  ;;  %vm507_vm1 = vweird.f32 %v1843_v58  ;;  %v626_v56 = vld [vmem:[#allocation10 + $0xb8] sm:$0xff] }
  0x83   : > { %v517_v62 = vmul.f32 %v1845_v59, %v500_v57  ;;  %vm522_vm3 = vweird.f32 %v1845_v59  ;;  %vm508_vm4 = vmor %vm506_vm0, %vm507_vm1  ;;  %v657_v57 = vld [vmem:[#allocation10 + $0x190] sm:$0xff]  ;;  %774 = vmatpush.msra.mxu3 %v626_v56  ;;  %v604_v56 = vld [vmem:[#allocation10 + $0x8] sm:$0xff] }
  0x84   : > { %v503_v63 = vsub.f32 1.0, %v502_v60  ;;  %vm523_vm6 = vmor %vm521_vm2, %vm522_vm3  ;;  %v624_v60 = vld [vmem:[#allocation10 + $0xa8] sm:$0xff]  ;;  %692 = vmatpush.msra.mxu0 %v657_v57  ;;  %v819_v57 = vld [vmem:[#allocation10 + $0x2b0] sm:$0xff] }
  0x85   : > { %v518_v2 = vsub.f32 1.0, %v517_v62  ;;  %v656_v62 = vld [vmem:[#allocation10 + $0x188] sm:$0xff]  ;;  %775 = vmatpush.msra.mxu3 %v624_v60  ;;  %v929_v60 = vld [vmem:[#allocation10 + $0x3f8] sm:$0xff] }
  0x86   : > { %v504_v4 = vmul.f32 %v1843_v58, %v503_v63  ;;  %v621_v63 = vld [vmem:[#allocation10 + $0x90] sm:$0xff]  ;;  %693 = vmatpush.msra.mxu0 %v655_v61  ;;  %v817_v61 = vld [vmem:[#allocation10 + $0x2a0] sm:$0xff] }
  0x87   : > { %v519_v6 = vmul.f32 %v1845_v59, %v518_v2  ;;  %v653_v2 = vld [vmem:[#allocation10 + $0x170] sm:$0xff]  ;;  %776 = vmatpush.msra.mxu3 %v622_v0  ;;  %v635_v0 = vld [vmem:[#allocation2 + $0x1] sm:$0xf] }
  0x88   : > { %v505_v7 = vadd.f32 %v1843_v58, %v504_v4  ;;  %v619_v4 = vld [vmem:[#allocation10 + $0x80] sm:$0xff]  ;;  %694 = vmatpush.msra.mxu0 %v653_v2  ;;  %675 = vst [vmem:[#allocation1] ss:$2 sm:$0xff] %v635_v0  ;;  %v815_v2 = vld [vmem:[#allocation10 + $0x290] sm:$0xff]  ;;  %v1030_v0 = vld [vmem:[#allocation10 + $0x4f8] sm:$0xff] }
  0x89   : > { %v520_v9 = vadd.f32 %v1845_v59, %v519_v6  ;;  %v651_v6 = vld [vmem:[#allocation10 + $0x160] sm:$0xff] }
  0x8a   : > { %v509_v10 = vsel %vm508_vm4, %v1843_v58, %v505_v7  ;;  %v658_v58 = vld [vmem:[#allocation10 + $0x198] sm:$0xff]  ;;  %v652_v7 = vld [vmem:[#allocation10 + $0x168] sm:$0xff]  ;;  %695 = vmatpush.msra.mxu0 %v651_v6  ;;  %v813_v6 = vld [vmem:[#allocation10 + $0x280] sm:$0xff] }
  0x8b   : > { %v2343_v11 = vsel %vm511_vm5, %v513_v5, %v509_v10  ;;  %v524_v12 = vsel %vm523_vm6, %v1845_v59, %v520_v9  ;;  %v623_v59 = vld [vmem:[#allocation10 + $0xa0] sm:$0xff]  ;;  %715 = vmatpush.msra.mxu1 %v658_v58  ;;  %v620_v5 = vld [vmem:[#allocation10 + $0x88] sm:$0xff]  ;;  %v618_v9 = vld [vmem:[#allocation10 + $0x78] sm:$0xff] }
  0x8c   : > { %v2345_v13 = vsel %vm526_vm7, %v528_v8, %v524_v12  ;;  %v531_v14 = vmul.f32 %v2343_v11, %v2343_v11  ;;  %752 = vmatpush.msra.mxu2 %v623_v59  ;;  %v617_v8 = vld [vmem:[#allocation10 + $0x70] sm:$0xff]  ;;  %v650_v12 = vld [vmem:[#allocation10 + $0x158] sm:$0xff]  ;;  %777 = vmatpush.msra.mxu3 %v620_v5 }
  0x8d   : > { %v532_v15 = vmul.f32 %v2345_v13, %v2345_v13  ;;  %716 = vmatpush.msra.mxu1 %v656_v62  ;;  %v649_v10 = vld [vmem:[#allocation10 + $0x150] sm:$0xff]  ;;  %v820_v58 = vld [vmem:[#allocation10 + $0x2b8] sm:$0xff]  ;;  %v818_v62 = vld [vmem:[#allocation10 + $0x2a8] sm:$0xff] }
  0x8e   : > { %753 = vmatpush.msra.mxu2 %v621_v63  ;;  %778 = vmatpush.msra.mxu3 %v618_v9  ;;  %v928_v59 = vld [vmem:[#allocation10 + $0x3f0] sm:$0xff]  ;;  %v926_v63 = vld [vmem:[#allocation10 + $0x3e0] sm:$0xff]  ;;  %v925_v5 = vld [vmem:[#allocation10 + $0x3d8] sm:$0xff] }
  0x8f   : > { %v533_v16 = vadd.f32 %v532_v15, %v531_v14  ;;  %717 = vmatpush.msra.mxu1 %v654_v3  ;;  %v615_v14 = vld [vmem:[#allocation10 + $0x60] sm:$0xff]  ;;  %v616_v15 = vld [vmem:[#allocation10 + $0x68] sm:$0xff]  ;;  %696 = vmatpush.msra.mxu0 %v649_v10  ;;  %v816_v3 = vld [vmem:[#allocation10 + $0x298] sm:$0xff] }
  0x90   : > { %754 = vmatpush.msra.mxu2 %v619_v4  ;;  %779 = vmatpush.msra.mxu3 %v616_v15  ;;  %v924_v4 = vld [vmem:[#allocation10 + $0x3d0] sm:$0xff]  ;;  %v923_v9 = vld [vmem:[#allocation10 + $0x3c8] sm:$0xff]  ;;  %v921_v15 = vld [vmem:[#allocation10 + $0x3b8] sm:$0xff] }
  0x91   : > { %534 = vadd.xlane.f32.xlu0 %v533_v16  ;;  %718 = vmatpush.msra.mxu1 %v652_v7  ;;  %v647_v16 = vld [vmem:[#allocation10 + $0x140] sm:$0xff]  ;;  %v814_v7 = vld [vmem:[#allocation10 + $0x288] sm:$0xff]  ;;  %v811_v10 = vld [vmem:[#allocation10 + $0x270] sm:$0xff] }
  0x92   : > { %755 = vmatpush.msra.mxu2 %v617_v8  ;;  %697 = vmatpush.msra.mxu0 %v647_v16  ;;  %v922_v8 = vld [vmem:[#allocation10 + $0x3c0] sm:$0xff] }
  0x93   : > { %719 = vmatpush.msra.mxu1 %v650_v12  ;;  %v812_v12 = vld [vmem:[#allocation10 + $0x278] sm:$0xff]  ;;  %v809_v16 = vld [vmem:[#allocation10 + $0x260] sm:$0xff] }
  0x94   : > { %756 = vmatpush.msra.mxu2 %v615_v14  ;;  %v920_v14 = vld [vmem:[#allocation10 + $0x3b0] sm:$0xff] }
 0x104   : > { %v535_v17 = vpop.xlane.xlu0 %534 }
 0x105   : > { %v536_v18 = vrot.slane %v535_v17, 4 }
 0x107   : > { %v537_v19 = vadd.f32 %v536_v18, %v535_v17  ;;  %v648_v17 = vld [vmem:[#allocation10 + $0x148] sm:$0xff] }
 0x108   : > { %720 = vmatpush.msra.mxu1 %v648_v17  ;;  %v810_v17 = vld [vmem:[#allocation10 + $0x268] sm:$0xff] }
 0x109   : > { %v538_v20 = vrot.slane %v537_v19, 2 }
 0x10b   : > { %v539_v21 = vadd.f32 %v538_v20, %v537_v19  ;;  %v613_v19 = vld [vmem:[#allocation10 + $0x50] sm:$0xff]  ;;  %v614_v20 = vld [vmem:[#allocation10 + $0x58] sm:$0xff] }
 0x10c   : > { %757 = vmatpush.msra.mxu2 %v613_v19  ;;  %780 = vmatpush.msra.mxu3 %v614_v20  ;;  %v919_v19 = vld [vmem:[#allocation10 + $0x3a8] sm:$0xff]  ;;  %v807_v20 = vld [vmem:[#allocation10 + $0x250] sm:$0xff] }
 0x10d   : > { %v540_v22 = vrot.slane %v539_v21, 1 }
 0x10f   : > { %v541_v23 = vadd.f32 %v540_v22, %v539_v21  ;;  %v645_v22 = vld [vmem:[#allocation10 + $0x130] sm:$0xff] }
 0x110   : > { %698 = vmatpush.msra.mxu0 %v645_v22  ;;  %v916_v22 = vld [vmem:[#allocation10 + $0x390] sm:$0xff] }
 0x111   : > { %1727 = vpush %v541_v23  ;;  %v646_v23 = vld [vmem:[#allocation10 + $0x138] sm:$0xff] }
 0x112   : > { %721 = vmatpush.msra.mxu1 %v646_v23  ;;  %v917_v23 = vld [vmem:[#allocation10 + $0x398] sm:$0xff] }
 0x142   : > { %s1728_s14 = spop %1727 }
 0x143   : > { %v543_v24 = vstv %s1728_s14  ;;  %s2029_s14 = sshra.s32 %s1531_s13, 4  ;;  %s2030_s14 = int_to_ptr.hbm [resolvable:$true] %s2029_s14 }
 0x144   : > { %1846 = vrsqrt.f32 %v543_v24  ;;  %vm551_vm8 = vcmp.eq.f32.partialorder %v543_v24, inf  ;;  %v554_v32 = vand.u32 2147483648, %v543_v24  ;;  %vm553_vm9 = vcmp.eq.f32.partialorder %v543_v24, 0.0  ;;  %p2036_p11 = scmp.lt.s32.totalorder %s2030_s14, %s2419_s6 }
 0x14a   : > { %v1847_v25 = vpop.eup %1846 }
 0x14b   : > { %v545_v26 = vmul.f32 %v1847_v25, %v543_v24 }
 0x14d   : > { %v546_v27 = vmul.f32 %v1847_v25, %v545_v26 }
 0x14f   : > { %v547_v28 = vmul.f32 0.5, %v546_v27  ;;  %v643_v27 = vld [vmem:[#allocation10 + $0x120] sm:$0xff] }
 0x150   : > { %699 = vmatpush.msra.mxu0 %v643_v27  ;;  %v915_v27 = vld [vmem:[#allocation10 + $0x388] sm:$0xff] }
 0x151   : > { %v548_v29 = vsub.f32 1.5, %v547_v28  ;;  %v644_v28 = vld [vmem:[#allocation10 + $0x128] sm:$0xff] }
 0x152   : > { %722 = vmatpush.msra.mxu1 %v644_v28  ;;  %v803_v28 = vld [vmem:[#allocation10 + $0x230] sm:$0xff] }
 0x153   : > { %v549_v30 = vmul.f32 %v1847_v25, %v548_v29  ;;  %v612_v25 = vld [vmem:[#allocation10 + $0x48] sm:$0xff] }
 0x154   : > { %781 = vmatpush.msra.mxu3 %v612_v25  ;;  %723 = vmatpush.msra.mxu1 %v642_v35  ;;  %v806_v25 = vld [vmem:[#allocation10 + $0x248] sm:$0xff] }
 0x155   : > { %v550_v31 = vmul.f32 %v549_v30, %v543_v24  ;;  %v609_v30 = vld [vmem:[#allocation10 + $0x30] sm:$0xff]  ;;  %v911_v35 = vld [vmem:[#allocation10 + $0x368] sm:$0xff] }
 0x156   : > { %724 = vmatpush.msra.mxu1 %v640_v40  ;;  %v579_v40 = vld [vmem:[%s2298_s30 + $0x8] sm:$0xff] }
 0x157   : > { %v552_v33 = vsel %vm551_vm8, %v543_v24, %v550_v31  ;;  %v611_v24 = vld [vmem:[#allocation10 + $0x40] sm:$0xff]  ;;  %v610_v31 = vld [vmem:[#allocation10 + $0x38] sm:$0xff] }
 0x158   : > { %v555_v34 = vsel %vm553_vm9, %v554_v32, %v552_v33  ;;  %758 = vmatpush.msra.mxu2 %v611_v24  ;;  %782 = vmatpush.msra.mxu3 %v610_v31  ;;  %v805_v24 = vld [vmem:[#allocation10 + $0x240] sm:$0xff]  ;;  %v913_v31 = vld [vmem:[#allocation10 + $0x378] sm:$0xff] }
 0x159   : > { %1729 = vpush %v555_v34  ;;  %v641_v34 = vld [vmem:[#allocation10 + $0x110] sm:$0xff]  ;;  %867 = vmatpush.msrb.mxu1 %v828_v43  ;;  %v797_v43 = vld [vmem:[#allocation10 + $0x200] sm:$0xff] }
 0x15a   : > { %759 = vmatpush.msra.mxu2 %v609_v30  ;;  %700 = vmatpush.msra.mxu0 %v641_v34  ;;  %v912_v30 = vld [vmem:[#allocation10 + $0x370] sm:$0xff]  ;;  %v910_v34 = vld [vmem:[#allocation10 + $0x360] sm:$0xff] }
 0x15b   : > { %783 = vmatpush.msra.mxu3 %v608_v37  ;;  %868 = vmatpush.msrb.mxu1 %v826_v49  ;;  %v800_v37 = vld [vmem:[#allocation10 + $0x218] sm:$0xff]  ;;  %v904_v49 = vld [vmem:[#allocation10 + $0x330] sm:$0xff] }
 0x15c   : > { %760 = vmatpush.msra.mxu2 %v607_v36  ;;  %701 = vmatpush.msra.mxu0 %v639_v39  ;;  %v799_v36 = vld [vmem:[#allocation10 + $0x210] sm:$0xff] }
 0x15d   : > { %784 = vmatpush.msra.mxu3 %v606_v46  ;;  %869 = vmatpush.msrb.mxu1 %v824_v51  ;;  %v578_v39 = vld [vmem:[%s2298_s30] sm:$0xff]  ;;  %s1672_s30 = sshll.u32 %s2295_s15, 5 }
 0x15e   : > { %844 = vmatpush.msrb.mxu0 %v827_v42  ;;  %761 = vmatpush.msra.mxu2 %v605_v45  ;;  %v906_v45 = vld [vmem:[#allocation10 + $0x340] sm:$0xff]  ;;  %s347_s20 = scalar_lea.vmem [#allocation14], %s1672_s30 }
 0x15f   : > { %870 = vmatpush.msrb.mxu1 %v822_v53  ;;  %785 = vmatpush.msra.mxu3 %v604_v56  ;;  %v902_v53 = vld [vmem:[#allocation10 + $0x320] sm:$0xff]  ;;  %s1528_s12 = sshll.u32 %s347_s20, 4  ;;  %s1529_s12 = int_to_ptr.vmem [resolvable:$true] %s1528_s12 }
 0x160   : > { %845 = vmatpush.msrb.mxu0 %v825_v48  ;;  %762 = vmatpush.msra.mxu2 %v603_v55  ;;  %v907_v48 = vld [vmem:[#allocation10 + $0x348] sm:$0xff] }
 0x161   : > { %871 = vmatpush.msrb.mxu1 %v820_v58  ;;  %968 = vmatpush.msrb.mxu3 %v929_v60  ;;  %v899_v58 = vld [vmem:[#allocation10 + $0x308] sm:$0xff] }
 0x162   : > { %846 = vmatpush.msrb.mxu0 %v823_v50  ;;  %945 = vmatpush.msrb.mxu2 %v928_v59  ;;  %v905_v50 = vld [vmem:[#allocation10 + $0x338] sm:$0xff] }
 0x163   : > { %872 = vmatpush.msrb.mxu1 %v818_v62  ;;  %v599_v62 = vld [vmem:[#allocation2] sm:$0xf] }
 0x164   : > { %847 = vmatpush.msrb.mxu0 %v821_v52  ;;  %946 = vmatpush.msrb.mxu2 %v926_v63  ;;  %v1029_v63 = vld [vmem:[#allocation10 + $0x4f0] sm:$0xff] }
 0x165   : > { %873 = vmatpush.msrb.mxu1 %v816_v3  ;;  %v1028_v3 = vld [vmem:[#allocation10 + $0x4e8] sm:$0xff] }
 0x166   : > { %848 = vmatpush.msrb.mxu0 %v819_v57  ;;  %947 = vmatpush.msrb.mxu2 %v924_v4  ;;  %v898_v57 = vld [vmem:[#allocation10 + $0x300] sm:$0xff] }
 0x167   : > { %874 = vmatpush.msrb.mxu1 %v814_v7 }
 0x168   : > { %849 = vmatpush.msrb.mxu0 %v817_v61  ;;  %948 = vmatpush.msrb.mxu2 %v922_v8  ;;  %v1025_v8 = vld [vmem:[#allocation10 + $0x4d0] sm:$0xff] }
 0x169   : > { %875 = vmatpush.msrb.mxu1 %v812_v12  ;;  %v1024_v12 = vld [vmem:[#allocation10 + $0x4c8] sm:$0xff] }
 0x16a   : > { %850 = vmatpush.msrb.mxu0 %v815_v2  ;;  %949 = vmatpush.msrb.mxu2 %v920_v14  ;;  %v1027_v2 = vld [vmem:[#allocation10 + $0x4e0] sm:$0xff] }
 0x16b   : > { %876 = vmatpush.msrb.mxu1 %v810_v17  ;;  %v793_v14 = vld [vmem:[#allocation2 + $0x2] sm:$0xf]  ;;  %v1130_v17 = vld [vmem:[#allocation10 + $0x5f0] sm:$0xff] }
 0x16c   : > { %851 = vmatpush.msrb.mxu0 %v813_v6 }
 0x16e   : > { %852 = vmatpush.msrb.mxu0 %v811_v10  ;;  %v1023_v10 = vld [vmem:[#allocation10 + $0x4c0] sm:$0xff] }
 0x170   : > { %853 = vmatpush.msrb.mxu0 %v809_v16  ;;  %v1022_v16 = vld [vmem:[#allocation10 + $0x4b8] sm:$0xff] }
 0x172   : > { %854 = vmatpush.msrb.mxu0 %v807_v20 }
 0x174   : > { %855 = vmatpush.msrb.mxu0 %v805_v24 }
 0x176   : > { %856 = vmatpush.msrb.mxu0 %v803_v28  ;;  %v1017_v28 = vld [vmem:[#allocation10 + $0x490] sm:$0xff] }
 0x18a   : > { %s1730_s17 = spop %1729 }
 0x18b   : > { %s557_s27 = smax.f32 %s2108_s18, %s1730_s17  ;;  %s2031_s17 = scalar_lea.hbm %s2030_s14, 32 }
 0x18c   : > { %v2351_v1 = vstv %s557_s27  ;;  %p2032_p1 = scmp.ne.s32.totalorder %s2030_s14, %s2031_s17 }
 0x18d   : > { %1848 = vrcp.f32 %v2351_v1  ;;  %v570_v29 = vand.u32 2147483648, %v2351_v1  ;;  %v568_v33 = vand.u32 2147483647, %v2351_v1  ;;  %vm564_vm11 = vweird.f32 %v2351_v1 }
 0x18e   : > { %p2033_p4 = pnand %p2032_p1, %p2246_p7 }
 0x18f   : > { %v571_v41 = vor.u32 1.1754944e-38, %v570_v29  ;;  %vm569_vm13 = vcmp.eq.f32.partialorder %v568_v33, 8.507059e+37  ;;  %v804_v29 = vld [vmem:[#allocation10 + $0x238] sm:$0xff]  ;;  %v802_v33 = vld [vmem:[#allocation10 + $0x228] sm:$0xff] }
 0x190   : > { %p2034_p8 = pneg %p2033_p4 }
 0x193   : > { %v1849_v18 = vpop.eup %1848 }
 0x194   : > { %v560_v21 = vmul.f32 %v1849_v18, %v2351_v1  ;;  %vm565_vm10 = vweird.f32 %v1849_v18  ;;  %v927_v1 = vld [vmem:[#allocation10 + $0x3e8] sm:$0xff] }
 0x195   : > { %vm566_vm12 = vmor %vm564_vm11, %vm565_vm10  ;;  %969 = vmatpush.msrb.mxu3 %v927_v1 }
 0x196   : > { %v561_v26 = vsub.f32 1.0, %v560_v21  ;;  %v808_v21 = vld [vmem:[#allocation10 + $0x258] sm:$0xff] }
 0x197   : > { %970 = vmatpush.msrb.mxu3 %v925_v5  ;;  %877 = vmatpush.msrb.mxu1 %v808_v21  ;;  %v1020_v21 = vld [vmem:[#allocation10 + $0x4a8] sm:$0xff] }
 0x198   : > { %v562_v32 = vmul.f32 %v1849_v18, %v561_v26  ;;  %v914_v26 = vld [vmem:[#allocation10 + $0x380] sm:$0xff] }
 0x199   : > { %971 = vmatpush.msrb.mxu3 %v923_v9  ;;  %878 = vmatpush.msrb.mxu1 %v806_v25  ;;  %v1026_v9 = vld [vmem:[#allocation10 + $0x4d8] sm:$0xff] }
 0x19a   : > { %v563_v38 = vadd.f32 %v1849_v18, %v562_v32  ;;  %v801_v32 = vld [vmem:[#allocation10 + $0x220] sm:$0xff] }
 0x19b   : > { %972 = vmatpush.msrb.mxu3 %v921_v15  ;;  %879 = vmatpush.msrb.mxu1 %v804_v29  ;;  %v1021_v15 = vld [vmem:[#allocation10 + $0x4b0] sm:$0xff]  ;;  %v1018_v29 = vld [vmem:[#allocation10 + $0x498] sm:$0xff] }
 0x19c   : > { %v567_v44 = vsel %vm566_vm12, %v1849_v18, %v563_v38  ;;  %v918_v18 = vld [vmem:[#allocation10 + $0x3a0] sm:$0xff]  ;;  %857 = vmatpush.msrb.mxu0 %v801_v32  ;;  %v908_v38 = vld [vmem:[#allocation10 + $0x350] sm:$0xff] }
 0x19d   : > { %v572_v47 = vsel %vm569_vm13, %v571_v41, %v567_v44  ;;  %950 = vmatpush.msrb.mxu2 %v918_v18  ;;  %973 = vmatpush.msrb.mxu3 %v919_v19  ;;  %v909_v41 = vld [vmem:[#allocation10 + $0x358] sm:$0xff]  ;;  %v798_v44 = vld [vmem:[#allocation10 + $0x208] sm:$0xff]  ;;  %v1019_v19 = vld [vmem:[#allocation10 + $0x4a0] sm:$0xff] }
 0x19e   : > { %1731 = vpush %v572_v47  ;;  %880 = vmatpush.msrb.mxu1 %v802_v33  ;;  %858 = vmatpush.msrb.mxu0 %v799_v36  ;;  %v1131_v18 = vld [vmem:[#allocation10 + $0x5f8] sm:$0xff]  ;;  %v1015_v32 = vld [vmem:[#allocation10 + $0x480] sm:$0xff]  ;;  %v1016_v33 = vld [vmem:[#allocation10 + $0x488] sm:$0xff] }
 0x19f   : > { %951 = vmatpush.msrb.mxu2 %v916_v22  ;;  %974 = vmatpush.msrb.mxu3 %v917_v23  ;;  %v1128_v22 = vld [vmem:[#allocation10 + $0x5e0] sm:$0xff] }
 0x1a0   : > { %881 = vmatpush.msrb.mxu1 %v800_v37  ;;  %859 = vmatpush.msrb.mxu0 %v797_v43  ;;  %v1123_v43 = vld [vmem:[#allocation10 + $0x5b8] sm:$0xff] }
 0x1a1   : > { %952 = vmatpush.msrb.mxu2 %v914_v26  ;;  %975 = vmatpush.msrb.mxu3 %v915_v27  ;;  %v1129_v26 = vld [vmem:[#allocation10 + $0x5e8] sm:$0xff] }
 0x1a2   : > { %882 = vmatpush.msrb.mxu1 %v798_v44  ;;  %v1011_v44 = vld [vmem:[#allocation10 + $0x460] sm:$0xff] }
 0x1a3   : > { %953 = vmatpush.msrb.mxu2 %v912_v30  ;;  %976 = vmatpush.msrb.mxu3 %v913_v31  ;;  %v1126_v30 = vld [vmem:[#allocation10 + $0x5d0] sm:$0xff]  ;;  %v1127_v31 = vld [vmem:[#allocation10 + $0x5d8] sm:$0xff] }
 0x1a5   : > { %954 = vmatpush.msrb.mxu2 %v910_v34  ;;  %977 = vmatpush.msrb.mxu3 %v911_v35  ;;  %v1124_v34 = vld [vmem:[#allocation10 + $0x5c0] sm:$0xff]  ;;  %v1125_v35 = vld [vmem:[#allocation10 + $0x5c8] sm:$0xff] }
 0x1a7   : > { %955 = vmatpush.msrb.mxu2 %v908_v38  ;;  %978 = vmatpush.msrb.mxu3 %v909_v41  ;;  %v1014_v41 = vld [vmem:[#allocation10 + $0x478] sm:$0xff] }
 0x1a9   : > { %956 = vmatpush.msrb.mxu2 %v906_v45  ;;  %979 = vmatpush.msrb.mxu3 %v907_v48  ;;  %v1120_v48 = vld [vmem:[#allocation10 + $0x5a0] sm:$0xff] }
 0x1ab   : > { %957 = vmatpush.msrb.mxu2 %v904_v49  ;;  %980 = vmatpush.msrb.mxu3 %v905_v50  ;;  %v1121_v49 = vld [vmem:[#allocation10 + $0x5a8] sm:$0xff]  ;;  %v1009_v50 = vld [vmem:[#allocation10 + $0x450] sm:$0xff] }
 0x1ad   : > { %958 = vmatpush.msrb.mxu2 %v902_v53  ;;  %981 = vmatpush.msrb.mxu3 %v903_v54  ;;  %v1119_v53 = vld [vmem:[#allocation10 + $0x598] sm:$0xff]  ;;  %v1007_v54 = vld [vmem:[#allocation10 + $0x440] sm:$0xff] }
 0x1cf   : > { %s1732_s19 = spop %1731 }
 0x1d0   : > { %s574_s11 = smul.f32 100.0, %s1732_s19  ;;  %s2035_s19 = scalar_lea.hbm %s2419_s6, 64 }
 0x1d1   : > { %p2037_p9 = scmp.lt.s32.totalorder %s2035_s19, %s2031_s17 }
 0x1d2   : > { %v575_v42 = vstv %s574_s11 }
 0x1d3   : > { %v576_v46 = vmul.f32 %v575_v42, %v2343_v11  ;;  %v577_v47 = vmul.f32 %v575_v42, %v2345_v13  ;;  %v900_v11 = vld [vmem:[#allocation10 + $0x310] sm:$0xff]  ;;  %v901_v13 = vld [vmem:[#allocation10 + $0x318] sm:$0xff]  ;;  %p2038_p2 = por %p2037_p9, %p2036_p11 }
 0x1d4   : > { %959 = vmatpush.msrb.mxu2 %v900_v11  ;;  %982 = vmatpush.msrb.mxu3 %v901_v13  ;;  %v1122_v42 = vld [vmem:[#allocation10 + $0x5b0] sm:$0xff]  ;;  %v1117_v11 = vld [vmem:[#allocation10 + $0x588] sm:$0xff] }
 0x1d5   : > { %v580_v51 = vmul.f32 %v578_v39, %v576_v46  ;;  %v581_v52 = vmul.f32 %v579_v40, %v577_v47  ;;  %v1013_v40 = vld [vmem:[#allocation10 + $0x470] sm:$0xff]  ;;  %v1012_v46 = vld [vmem:[#allocation10 + $0x468] sm:$0xff]  ;;  %p2039_p10 = pnand %p2038_p2, %p2034_p8 }
 0x1d6   : > { %960 = vmatpush.msrb.mxu2 %v898_v57  ;;  %983 = vmatpush.msrb.mxu3 %v899_v58 }
 0x1d7   : > { %v590_v55 = vrot.slane %v580_v51, 4  ;;  %v591_v56 = vrot.slane %v581_v52, 4  ;;  %595 = vst [vmem:[#allocation2 + $0x9] sm:$0xf] %v580_v51  ;;  %v1010_v51 = vld [vmem:[#allocation10 + $0x458] sm:$0xff] }
 0x1d8   : > { %597 = vst [vmem:[#allocation2 + $0x19] sm:$0xf] %v581_v52  ;;  %v1118_v52 = vld [vmem:[#allocation10 + $0x590] sm:$0xff] }
 0x1d9   : > { %596 = vst [vmem:[#allocation2 + $0x11] sm:$0xf] %v590_v55  ;;  %v1008_v55 = vld [vmem:[#allocation10 + $0x448] sm:$0xff] }
 0x1da   : > { %598 = vst [vmem:[#allocation2 + $0x21] sm:$0xf] %v591_v56  ;;  %v1116_v56 = vld [vmem:[#allocation10 + $0x580] sm:$0xff] }
 0x1de   : > { %v636_v59 = vld [vmem:[#allocation2 + $0x9] sm:$0xf] }
 0x1df   : > { %v638_v60 = vld [vmem:[#allocation2 + $0x19] sm:$0xf]  ;;  %677 = vst [vmem:[#allocation1 + $0x1] ss:$2 sm:$0xff] %v636_v59  ;;  %v600_v4 = vld [vmem:[#allocation2 + $0x8] sm:$0xf] }
 0x1e0   : > { %v637_v61 = vld [vmem:[#allocation2 + $0x11] sm:$0xf]  ;;  %681 = vst [vmem:[#allocation1 + $0x11] ss:$2 sm:$0xff] %v638_v60  ;;  %v602_v7 = vld [vmem:[#allocation2 + $0x18] sm:$0xf] }
 0x1e1   : > { %679 = vst [vmem:[#allocation1 + $0x10] ss:$2 sm:$0xff] %v637_v61  ;;  %v601_v5 = vld [vmem:[#allocation2 + $0x10] sm:$0xf]  ;;  %v794_v23 = vld [vmem:[#allocation2 + $0xa] sm:$0xf] }
 0x1e2   : > { %v795_v24 = vld [vmem:[#allocation2 + $0x12] sm:$0xf]  ;;  %v796_v27 = vld [vmem:[#allocation2 + $0x1a] sm:$0xf]  ;;  %v894_v36 = vld [vmem:[#allocation2 + $0x8] sm:$0xf] }
 0x1e3   : > { %v895_v37 = vld [vmem:[#allocation2 + $0x10] sm:$0xf]  ;;  %v896_v39 = vld [vmem:[#allocation2 + $0x18] sm:$0xf]  ;;  %v897_v47 = vld [vmem:[#allocation2 + $0x20] sm:$0xf] }
 0x1e4   : > { %v995_v13 = vld [vmem:[#allocation2 + $0x9] sm:$0xf]  ;;  %v996_v57 = vld [vmem:[#allocation2 + $0x11] sm:$0xf]  ;;  %v997_v58 = vld [vmem:[#allocation2 + $0x19] sm:$0xf] }
 0x1e5   : > { %v1005_v60 = vld [vmem:[#allocation10 + $0x430] sm:$0xff]  ;;  %v1006_v61 = vld [vmem:[#allocation10 + $0x438] sm:$0xff] }
 0x1e6   : > { %v682_v1 = vld.sshfl [vmem:[#allocation1] sm:$0xff pattern:$0x75316420] }
 0x1e7   : > { %736 = vst [vmem:[#allocation1] ss:$2 sm:$0xff] %v599_v62  ;;  %702 = vmatmul.f32.vlgmr.msra.gmra.mxu0 %v682_v1  ;;  %725 = vmatmul.f32.vlgmr.msra.gmra.mxu1 %v682_v1  ;;  %v1114_v62 = vld [vmem:[#allocation10 + $0x570] sm:$0xff]  ;;  %v998_v1 = vld [vmem:[#allocation2 + $0x21] sm:$0xf] }
 0x1e8   : > { %v683_v6 = vld.sshfl [vmem:[#allocation1 + $0x10] sm:$0xff pattern:$0x75316420]  ;;  %738 = vst [vmem:[#allocation1 + $0x1] ss:$2 sm:$0xff] %v600_v4  ;;  %1046 = vmatpush.msra.mxu0 %v1029_v63  ;;  %1069 = vmatpush.msra.mxu1 %v1030_v0  ;;  %v1115_v63 = vld [vmem:[#allocation10 + $0x578] sm:$0xff] }
 0x1e9   : > { %740 = vst [vmem:[#allocation1 + $0x10] ss:$2 sm:$0xff] %v601_v5  ;;  %v1112_v4 = vld [vmem:[#allocation10 + $0x560] sm:$0xff]  ;;  %v1113_v5 = vld [vmem:[#allocation10 + $0x568] sm:$0xff] }
 0x1ea   : > { %742 = vst [vmem:[#allocation1 + $0x11] ss:$2 sm:$0xff] %v602_v7  ;;  %1047 = vmatpush.msra.mxu0 %v1027_v2  ;;  %1070 = vmatpush.msra.mxu1 %v1028_v3  ;;  %v1003_v2 = vld [vmem:[#allocation10 + $0x420] sm:$0xff]  ;;  %v1004_v3 = vld [vmem:[#allocation10 + $0x428] sm:$0xff]  ;;  %v1002_v7 = vld [vmem:[#allocation10 + $0x418] sm:$0xff] }
 0x1ec   : > { %1048 = vmatpush.msra.mxu0 %v1025_v8  ;;  %1071 = vmatpush.msra.mxu1 %v1026_v9  ;;  %v1110_v8 = vld [vmem:[#allocation10 + $0x550] sm:$0xff]  ;;  %v1111_v9 = vld [vmem:[#allocation10 + $0x558] sm:$0xff] }
 0x1ee   : > { %1049 = vmatpush.msra.mxu0 %v1023_v10  ;;  %1072 = vmatpush.msra.mxu1 %v1024_v12  ;;  %v999_v10 = vld [vmem:[#allocation10 + $0x400] sm:$0xff]  ;;  %v1000_v12 = vld [vmem:[#allocation10 + $0x408] sm:$0xff] }
 0x1ef   : > { %v743_v20 = vld.sshfl [vmem:[#allocation1] sm:$0xff pattern:$0x75316420]  ;;  %705 = vmatmul.f32.gmra.mxu0 %v683_v6  ;;  %728 = vmatmul.f32.gmra.mxu1 %v683_v6  ;;  %v1001_v6 = vld [vmem:[#allocation10 + $0x410] sm:$0xff] }
 0x1f0   : > { %833 = vst [vmem:[#allocation1] ss:$2 sm:$0xff] %v793_v14  ;;  %763 = vmatmul.f32.vlgmr.msra.gmra.mxu2 %v743_v20  ;;  %786 = vmatmul.f32.vlgmr.msra.gmra.mxu3 %v743_v20  ;;  %v1096_v14 = vld [vmem:[#allocation2 + $0xa] sm:$0xf]  ;;  %v1097_v20 = vld [vmem:[#allocation2 + $0x12] sm:$0xf] }
 0x1f1   : > { %v744_v25 = vld.sshfl [vmem:[#allocation1 + $0x10] sm:$0xff pattern:$0x75316420]  ;;  %835 = vst [vmem:[#allocation1 + $0x1] ss:$2 sm:$0xff] %v794_v23  ;;  %1050 = vmatpush.msra.mxu0 %v1021_v15  ;;  %1073 = vmatpush.msra.mxu1 %v1022_v16  ;;  %v1108_v15 = vld [vmem:[#allocation10 + $0x540] sm:$0xff] }
 0x1f2   : > { %837 = vst [vmem:[#allocation1 + $0x10] ss:$2 sm:$0xff] %v795_v24  ;;  %1147 = vmatpush.msra.mxu2 %v1130_v17  ;;  %1170 = vmatpush.msra.mxu3 %v1131_v18  ;;  %v1109_v16 = vld [vmem:[#allocation10 + $0x548] sm:$0xff]  ;;  %v1232_v17 = vld [vmem:[#allocation10 + $0x6f0] sm:$0xff]  ;;  %v1233_v18 = vld [vmem:[#allocation10 + $0x6f8] sm:$0xff] }
 0x1f3   : > { %839 = vst [vmem:[#allocation1 + $0x11] ss:$2 sm:$0xff] %v796_v27  ;;  %1051 = vmatpush.msra.mxu0 %v1019_v19  ;;  %1074 = vmatpush.msra.mxu1 %v1020_v21  ;;  %v1098_v21 = vld [vmem:[#allocation2 + $0x1a] sm:$0xf]  ;;  %v1099_v23 = vld [vmem:[#allocation2 + $0x22] sm:$0xf] }
 0x1f4   : > { %1148 = vmatpush.msra.mxu2 %v1128_v22  ;;  %1171 = vmatpush.msra.mxu3 %v1129_v26  ;;  %v1106_v24 = vld [vmem:[#allocation10 + $0x530] sm:$0xff]  ;;  %v1230_v26 = vld [vmem:[#allocation10 + $0x6e0] sm:$0xff]  ;;  %v1231_v27 = vld [vmem:[#allocation10 + $0x6e8] sm:$0xff] }
 0x1f5   : > { %1052 = vmatpush.msra.mxu0 %v1017_v28  ;;  %1075 = vmatpush.msra.mxu1 %v1018_v29  ;;  %v1104_v28 = vld [vmem:[#allocation10 + $0x520] sm:$0xff]  ;;  %v1105_v29 = vld [vmem:[#allocation10 + $0x528] sm:$0xff] }
 0x1f6   : > { %1149 = vmatpush.msra.mxu2 %v1126_v30  ;;  %1172 = vmatpush.msra.mxu3 %v1127_v31  ;;  %v1228_v30 = vld [vmem:[#allocation10 + $0x6d0] sm:$0xff]  ;;  %v1229_v31 = vld [vmem:[#allocation10 + $0x6d8] sm:$0xff] }
 0x1f7   : > { %1053 = vmatpush.msra.mxu0 %v1015_v32  ;;  %1076 = vmatpush.msra.mxu1 %v1016_v33  ;;  %v1198_v32 = vld [vmem:[#allocation2 + $0x10] sm:$0xf] }
 0x1f8   : > { %v840_v38 = vld.sshfl [vmem:[#allocation1] sm:$0xff pattern:$0x75316420]  ;;  %1150 = vmatpush.msra.mxu2 %v1124_v34  ;;  %1173 = vmatpush.msra.mxu3 %v1125_v35  ;;  %v1102_v33 = vld [vmem:[#allocation10 + $0x510] sm:$0xff] }
 0x1f9   : > { %934 = vst [vmem:[#allocation1] ss:$2 sm:$0xff] %v894_v36  ;;  %766 = vmatmul.f32.gmra.mxu2 %v744_v25  ;;  %789 = vmatmul.f32.gmra.mxu3 %v744_v25  ;;  %v1107_v25 = vld [vmem:[#allocation10 + $0x538] sm:$0xff]  ;;  %v1226_v36 = vld [vmem:[#allocation10 + $0x6c0] sm:$0xff] }
 0x1fa   : > { %v841_v45 = vld.sshfl [vmem:[#allocation1 + $0x10] sm:$0xff pattern:$0x75316420]  ;;  %936 = vst [vmem:[#allocation1 + $0x1] ss:$2 sm:$0xff] %v895_v37  ;;  %860 = vmatmul.f32.vlgmr.msrb.gmra.mxu0 %v840_v38  ;;  %883 = vmatmul.f32.vlgmr.msrb.gmra.mxu1 %v840_v38  ;;  %v1103_v34 = vld [vmem:[#allocation10 + $0x518] sm:$0xff] }
 0x1fb   : > { %938 = vst [vmem:[#allocation1 + $0x10] ss:$2 sm:$0xff] %v896_v39  ;;  %1054 = vmatpush.msra.mxu0 %v1013_v40  ;;  %1077 = vmatpush.msra.mxu1 %v1014_v41  ;;  %v1199_v35 = vld [vmem:[#allocation2 + $0x18] sm:$0xf]  ;;  %v1227_v37 = vld [vmem:[#allocation10 + $0x6c8] sm:$0xff]  ;;  %v1100_v38 = vld [vmem:[#allocation10 + $0x500] sm:$0xff] }
 0x1fc   : > { %940 = vst [vmem:[#allocation1 + $0x11] ss:$2 sm:$0xff] %v897_v47  ;;  %1151 = vmatpush.msra.mxu2 %v1122_v42  ;;  %1174 = vmatpush.msra.mxu3 %v1123_v43  ;;  %v1200_v39 = vld [vmem:[#allocation2 + $0x20] sm:$0xf]  ;;  %v1101_v40 = vld [vmem:[#allocation10 + $0x508] sm:$0xff]  ;;  %v1224_v41 = vld [vmem:[#allocation10 + $0x6b0] sm:$0xff] }
 0x1fd   : > { %1055 = vmatpush.msra.mxu0 %v1011_v44  ;;  %1078 = vmatpush.msra.mxu1 %v1012_v46  ;;  %v1225_v43 = vld [vmem:[#allocation10 + $0x6b8] sm:$0xff]  ;;  %v1333_v44 = vld [vmem:[#allocation10 + $0x7f0] sm:$0xff] }
 0x1fe   : > { %1152 = vmatpush.msra.mxu2 %v1120_v48  ;;  %1175 = vmatpush.msra.mxu3 %v1121_v49  ;;  %v1334_v46 = vld [vmem:[#allocation10 + $0x7f8] sm:$0xff]  ;;  %v1222_v48 = vld [vmem:[#allocation10 + $0x6a0] sm:$0xff]  ;;  %v1223_v49 = vld [vmem:[#allocation10 + $0x6a8] sm:$0xff] }
 0x1ff   : > { %1056 = vmatpush.msra.mxu0 %v1009_v50  ;;  %1079 = vmatpush.msra.mxu1 %v1010_v51  ;;  %v1331_v50 = vld [vmem:[#allocation10 + $0x7e0] sm:$0xff]  ;;  %v1332_v51 = vld [vmem:[#allocation10 + $0x7e8] sm:$0xff] }
 0x200   : > { %1153 = vmatpush.msra.mxu2 %v1118_v52  ;;  %1176 = vmatpush.msra.mxu3 %v1119_v53  ;;  %v1299_v52 = vld [vmem:[#allocation2 + $0x11] sm:$0xf] }
 0x201   : > { %1057 = vmatpush.msra.mxu0 %v1007_v54  ;;  %1080 = vmatpush.msra.mxu1 %v1008_v55  ;;  %v941_v59 = vld.sshfl [vmem:[#allocation1] sm:$0xff pattern:$0x75316420]  ;;  %v1220_v53 = vld [vmem:[#allocation10 + $0x690] sm:$0xff] }
 0x202   : > { %1154 = vmatpush.msra.mxu2 %v1116_v56  ;;  %1177 = vmatpush.msra.mxu3 %v1117_v11  ;;  %1035 = vst [vmem:[#allocation1] ss:$2 sm:$0xff] %v995_v13  ;;  %v1221_v54 = vld [vmem:[#allocation10 + $0x698] sm:$0xff]  ;;  %v1329_v56 = vld [vmem:[#allocation10 + $0x7d0] sm:$0xff]  ;;  %v1218_v13 = vld [vmem:[#allocation10 + $0x680] sm:$0xff] }
 0x203   : > { %863 = vmatmul.f32.gmra.mxu0 %v841_v45  ;;  %886 = vmatmul.f32.gmra.mxu1 %v841_v45  ;;  %1037 = vst [vmem:[#allocation1 + $0x1] ss:$2 sm:$0xff] %v996_v57  ;;  %v942_v0 = vld.sshfl [vmem:[#allocation1 + $0x10] sm:$0xff pattern:$0x75316420]  ;;  %v1330_v11 = vld [vmem:[#allocation10 + $0x7d8] sm:$0xff] }
 0x204   : > { %961 = vmatmul.f32.vlgmr.msrb.gmra.mxu2 %v941_v59  ;;  %984 = vmatmul.f32.vlgmr.msrb.gmra.mxu3 %v941_v59  ;;  %1039 = vst [vmem:[#allocation1 + $0x10] ss:$2 sm:$0xff] %v997_v58  ;;  %v1201_v45 = vld [vmem:[#allocation2 + $0x28] sm:$0xf]  ;;  %v1300_v55 = vld [vmem:[#allocation2 + $0x19] sm:$0xf] }
 0x205   : > { %1058 = vmatpush.msra.mxu0 %v1005_v60  ;;  %1081 = vmatpush.msra.mxu1 %v1006_v61  ;;  %1041 = vst [vmem:[#allocation1 + $0x11] ss:$2 sm:$0xff] %v998_v1  ;;  %v1301_v57 = vld [vmem:[#allocation2 + $0x21] sm:$0xf]  ;;  %v1219_v58 = vld [vmem:[#allocation10 + $0x688] sm:$0xff] }
 0x206   : > { %1155 = vmatpush.msra.mxu2 %v1114_v62  ;;  %1178 = vmatpush.msra.mxu3 %v1115_v63  ;;  %v1327_v59 = vld [vmem:[#allocation10 + $0x7c0] sm:$0xff]  ;;  %v1328_v61 = vld [vmem:[#allocation10 + $0x7c8] sm:$0xff]  ;;  %v1216_v62 = vld [vmem:[#allocation10 + $0x670] sm:$0xff] }
 0x207   : > { %1059 = vmatpush.msra.mxu0 %v1003_v2  ;;  %1082 = vmatpush.msra.mxu1 %v1004_v3  ;;  %v1302_v63 = vld [vmem:[#allocation2 + $0x29] sm:$0xf]  ;;  %v1325_v2 = vld [vmem:[#allocation10 + $0x7b0] sm:$0xff]  ;;  %v1326_v3 = vld [vmem:[#allocation10 + $0x7b8] sm:$0xff] }
 0x208   : > { %1156 = vmatpush.msra.mxu2 %v1112_v4  ;;  %1179 = vmatpush.msra.mxu3 %v1113_v5  ;;  %v1214_v4 = vld [vmem:[#allocation10 + $0x660] sm:$0xff]  ;;  %v1215_v5 = vld [vmem:[#allocation10 + $0x668] sm:$0xff] }
 0x209   : > { %1060 = vmatpush.msra.mxu0 %v1001_v6  ;;  %1083 = vmatpush.msra.mxu1 %v1002_v7  ;;  %v1323_v6 = vld [vmem:[#allocation10 + $0x7a0] sm:$0xff]  ;;  %v1324_v7 = vld [vmem:[#allocation10 + $0x7a8] sm:$0xff] }
 0x20a   : > { %1157 = vmatpush.msra.mxu2 %v1110_v8  ;;  %1180 = vmatpush.msra.mxu3 %v1111_v9  ;;  %v1042_v19 = vld.sshfl [vmem:[#allocation1] sm:$0xff pattern:$0x75316420]  ;;  %v1400_v8 = vld [vmem:[#allocation2 + $0x12] sm:$0xf] }
 0x20b   : > { %1061 = vmatpush.msra.mxu0 %v999_v10  ;;  %1084 = vmatpush.msra.mxu1 %v1000_v12  ;;  %1136 = vst [vmem:[#allocation1] ss:$2 sm:$0xff] %v1096_v14  ;;  %v1212_v9 = vld [vmem:[#allocation10 + $0x650] sm:$0xff]  ;;  %v1213_v10 = vld [vmem:[#allocation10 + $0x658] sm:$0xff] }
 0x20c   : > { %1158 = vmatpush.msra.mxu2 %v1108_v15  ;;  %1181 = vmatpush.msra.mxu3 %v1109_v16  ;;  %1138 = vst [vmem:[#allocation1 + $0x1] ss:$2 sm:$0xff] %v1097_v20  ;;  %v1043_v22 = vld.sshfl [vmem:[#allocation1 + $0x10] sm:$0xff pattern:$0x75316420]  ;;  %v1321_v14 = vld [vmem:[#allocation10 + $0x790] sm:$0xff] }
 0x20d   : > { %1249 = vmatpush.msrb.mxu0 %v1232_v17  ;;  %1272 = vmatpush.msrb.mxu1 %v1233_v18  ;;  %1140 = vst [vmem:[#allocation1 + $0x10] ss:$2 sm:$0xff] %v1098_v21  ;;  %v1401_v12 = vld [vmem:[#allocation2 + $0x1a] sm:$0xf]  ;;  %v1210_v16 = vld [vmem:[#allocation10 + $0x640] sm:$0xff]  ;;  %v1211_v18 = vld [vmem:[#allocation10 + $0x648] sm:$0xff] }
 0x20e   : > { %964 = vmatmul.f32.gmra.mxu2 %v942_v0  ;;  %987 = vmatmul.f32.gmra.mxu3 %v942_v0  ;;  %1142 = vst [vmem:[#allocation1 + $0x11] ss:$2 sm:$0xff] %v1099_v23  ;;  %v1217_v0 = vld [vmem:[#allocation10 + $0x678] sm:$0xff]  ;;  %v1402_v17 = vld [vmem:[#allocation2 + $0x22] sm:$0xf]  ;;  %v1320_v21 = vld [vmem:[#allocation10 + $0x788] sm:$0xff] }
 0x20f   : > { %1062 = vmatmul.f32.vlgmr.msra.gmra.mxu0 %v1042_v19  ;;  %1085 = vmatmul.f32.vlgmr.msra.gmra.mxu1 %v1042_v19  ;;  %v1322_v15 = vld [vmem:[#allocation10 + $0x798] sm:$0xff]  ;;  %v1319_v19 = vld [vmem:[#allocation10 + $0x780] sm:$0xff]  ;;  %v1403_v23 = vld [vmem:[#allocation2 + $0x2a] sm:$0xf] }
 0x210   : > { %1159 = vmatpush.msra.mxu2 %v1106_v24  ;;  %1182 = vmatpush.msra.mxu3 %v1107_v25  ;;  %v1209_v24 = vld [vmem:[#allocation10 + $0x638] sm:$0xff] }
 0x211   : > { %1250 = vmatpush.msrb.mxu0 %v1230_v26  ;;  %1273 = vmatpush.msrb.mxu1 %v1231_v27  ;;  %v1317_v26 = vld [vmem:[#allocation10 + $0x770] sm:$0xff]  ;;  %v1318_v27 = vld [vmem:[#allocation10 + $0x778] sm:$0xff] }
 0x212   : > { %1160 = vmatpush.msra.mxu2 %v1104_v28  ;;  %1183 = vmatpush.msra.mxu3 %v1105_v29  ;;  %v1206_v28 = vld [vmem:[#allocation10 + $0x620] sm:$0xff]  ;;  %v1207_v29 = vld [vmem:[#allocation10 + $0x628] sm:$0xff] }
 0x213   : > { %1251 = vmatpush.msrb.mxu0 %v1228_v30  ;;  %1274 = vmatpush.msrb.mxu1 %v1229_v31  ;;  %v1143_v42 = vld.sshfl [vmem:[#allocation1] sm:$0xff pattern:$0x75316420]  ;;  %v1315_v30 = vld [vmem:[#allocation10 + $0x760] sm:$0xff]  ;;  %v1316_v31 = vld [vmem:[#allocation10 + $0x768] sm:$0xff] }
 0x214   : > { %1161 = vmatpush.msra.mxu2 %v1102_v33  ;;  %1184 = vmatpush.msra.mxu3 %v1103_v34  ;;  %1238 = vst [vmem:[#allocation1] ss:$2 sm:$0xff] %v1198_v32  ;;  %v1204_v32 = vld [vmem:[#allocation10 + $0x610] sm:$0xff]  ;;  %v1205_v33 = vld [vmem:[#allocation10 + $0x618] sm:$0xff] }
 0x215   : > { %1252 = vmatpush.msrb.mxu0 %v1226_v36  ;;  %1275 = vmatpush.msrb.mxu1 %v1227_v37  ;;  %1240 = vst [vmem:[#allocation1 + $0x1] ss:$2 sm:$0xff] %v1199_v35  ;;  %v1144_v47 = vld.sshfl [vmem:[#allocation1 + $0x10] sm:$0xff pattern:$0x75316420]  ;;  %v1313_v34 = vld [vmem:[#allocation10 + $0x750] sm:$0xff] }
 0x216   : > { %1162 = vmatpush.msra.mxu2 %v1100_v38  ;;  %1185 = vmatpush.msra.mxu3 %v1101_v40  ;;  %1242 = vst [vmem:[#allocation1 + $0x10] ss:$2 sm:$0xff] %v1200_v39  ;;  %v1314_v35 = vld [vmem:[#allocation10 + $0x758] sm:$0xff]  ;;  %v1202_v36 = vld [vmem:[#allocation10 + $0x600] sm:$0xff]  ;;  %v1203_v37 = vld [vmem:[#allocation10 + $0x608] sm:$0xff] }
 0x217   : > { %1253 = vmatpush.msrb.mxu0 %v1224_v41  ;;  %1276 = vmatpush.msrb.mxu1 %v1225_v43  ;;  %1244 = vst [vmem:[#allocation1 + $0x11] ss:$2 sm:$0xff] %v1201_v45  ;;  %v1311_v38 = vld [vmem:[#allocation10 + $0x740] sm:$0xff]  ;;  %v1312_v39 = vld [vmem:[#allocation10 + $0x748] sm:$0xff]  ;;  %v1434_v40 = vld [vmem:[#allocation10 + $0x8f0] sm:$0xff] }
 0x218   : > { %1350 = vmatpush.msrb.mxu2 %v1333_v44  ;;  %1373 = vmatpush.msrb.mxu3 %v1334_v46  ;;  %v1435_v41 = vld [vmem:[#allocation10 + $0x8f8] sm:$0xff]  ;;  %v1432_v44 = vld [vmem:[#allocation10 + $0x8e0] sm:$0xff]  ;;  %v1433_v45 = vld [vmem:[#allocation10 + $0x8e8] sm:$0xff] }
 0x219   : > { %1065 = vmatmul.f32.gmra.mxu0 %v1043_v22  ;;  %1088 = vmatmul.f32.gmra.mxu1 %v1043_v22  ;;  %v1208_v22 = vld [vmem:[#allocation10 + $0x630] sm:$0xff]  ;;  %v1310_v43 = vld [vmem:[#allocation10 + $0x738] sm:$0xff]  ;;  %v1307_v46 = vld [vmem:[#allocation10 + $0x720] sm:$0xff] }
 0x21a   : > { %1163 = vmatmul.f32.vlgmr.msra.gmra.mxu2 %v1143_v42  ;;  %1186 = vmatmul.f32.vlgmr.msra.gmra.mxu3 %v1143_v42  ;;  %v1309_v42 = vld [vmem:[#allocation10 + $0x730] sm:$0xff] }
 0x21b   : > { %1254 = vmatpush.msrb.mxu0 %v1222_v48  ;;  %1277 = vmatpush.msrb.mxu1 %v1223_v49  ;;  %v1430_v48 = vld [vmem:[#allocation10 + $0x8d0] sm:$0xff]  ;;  %v1431_v49 = vld [vmem:[#allocation10 + $0x8d8] sm:$0xff] }
 0x21c   : > { %1351 = vmatpush.msrb.mxu2 %v1331_v50  ;;  %1374 = vmatpush.msrb.mxu3 %v1332_v51  ;;  %v2363_v60 = vld.sshfl [vmem:[#allocation1] sm:$0xff pattern:$0x75316420]  ;;  %v1305_v50 = vld [vmem:[#allocation10 + $0x710] sm:$0xff] }
 0x21d   : > { %1255 = vmatpush.msrb.mxu0 %v1220_v53  ;;  %1278 = vmatpush.msrb.mxu1 %v1221_v54  ;;  %1339 = vst [vmem:[#allocation1] ss:$2 sm:$0xff] %v1299_v52  ;;  %v1306_v51 = vld [vmem:[#allocation10 + $0x718] sm:$0xff]  ;;  %v1428_v52 = vld [vmem:[#allocation10 + $0x8c0] sm:$0xff]  ;;  %v1429_v53 = vld [vmem:[#allocation10 + $0x8c8] sm:$0xff] }
 0x21e   : > { %1352 = vmatpush.msrb.mxu2 %v1329_v56  ;;  %1375 = vmatpush.msrb.mxu3 %v1330_v11  ;;  %1341 = vst [vmem:[#allocation1 + $0x1] ss:$2 sm:$0xff] %v1300_v55  ;;  %v2365_v1 = vld.sshfl [vmem:[#allocation1 + $0x10] sm:$0xff pattern:$0x75316420]  ;;  %v1303_v54 = vld [vmem:[#allocation10 + $0x700] sm:$0xff] }
 0x21f   : > { %1256 = vmatpush.msrb.mxu0 %v1218_v13  ;;  %1279 = vmatpush.msrb.mxu1 %v1219_v58  ;;  %1343 = vst [vmem:[#allocation1 + $0x10] ss:$2 sm:$0xff] %v1301_v57  ;;  %v1304_v55 = vld [vmem:[#allocation10 + $0x708] sm:$0xff]  ;;  %v1426_v56 = vld [vmem:[#allocation10 + $0x8b0] sm:$0xff]  ;;  %v1427_v11 = vld [vmem:[#allocation10 + $0x8b8] sm:$0xff] }
 0x220   : > { %1353 = vmatpush.msrb.mxu2 %v1327_v59  ;;  %1376 = vmatpush.msrb.mxu3 %v1328_v61  ;;  %1345 = vst [vmem:[#allocation1 + $0x11] ss:$2 sm:$0xff] %v1302_v63  ;;  %v1424_v13 = vld [vmem:[#allocation10 + $0x8a0] sm:$0xff]  ;;  %v1425_v57 = vld [vmem:[#allocation10 + $0x8a8] sm:$0xff]  ;;  %v1422_v58 = vld [vmem:[#allocation10 + $0x890] sm:$0xff] }
 0x221   : > { %1257 = vmatpush.msrb.mxu0 %v1216_v62  ;;  %1280 = vmatpush.msrb.mxu1 %v1217_v0  ;;  %v1423_v59 = vld [vmem:[#allocation10 + $0x898] sm:$0xff]  ;;  %v1421_v61 = vld [vmem:[#allocation10 + $0x888] sm:$0xff]  ;;  %v1418_v62 = vld [vmem:[#allocation10 + $0x870] sm:$0xff] }
 0x222   : > { %1354 = vmatpush.msrb.mxu2 %v1325_v2  ;;  %1377 = vmatpush.msrb.mxu3 %v1326_v3  ;;  %v1419_v63 = vld [vmem:[#allocation10 + $0x878] sm:$0xff]  ;;  %v1416_v0 = vld [vmem:[#allocation10 + $0x860] sm:$0xff]  ;;  %v1414_v2 = vld [vmem:[#allocation10 + $0x850] sm:$0xff] }
 0x223   : > { %1166 = vmatmul.f32.gmra.mxu2 %v1144_v47  ;;  %1189 = vmatmul.f32.gmra.mxu3 %v1144_v47  ;;  %v1308_v47 = vld [vmem:[#allocation10 + $0x728] sm:$0xff]  ;;  %v1415_v3 = vld [vmem:[#allocation10 + $0x858] sm:$0xff] }
 0x224   : > { %1258 = vmatpush.msrb.mxu0 %v1214_v4  ;;  %1281 = vmatpush.msrb.mxu1 %v1215_v5  ;;  %v1412_v4 = vld [vmem:[#allocation10 + $0x840] sm:$0xff]  ;;  %v1413_v5 = vld [vmem:[#allocation10 + $0x848] sm:$0xff] }
 0x225   : > { %1355 = vmatpush.msrb.mxu2 %v1323_v6  ;;  %1378 = vmatpush.msrb.mxu3 %v1324_v7  ;;  %v2367_v20 = vld.sshfl [vmem:[#allocation1] sm:$0xff pattern:$0x75316420]  ;;  %v1410_v6 = vld [vmem:[#allocation10 + $0x830] sm:$0xff] }
 0x226   : > { %1259 = vmatpush.msrb.mxu0 %v1212_v9  ;;  %1282 = vmatpush.msrb.mxu1 %v1213_v10  ;;  %1440 = vst [vmem:[#allocation1] ss:$2 sm:$0xff] %v1400_v8  ;;  %v1411_v7 = vld [vmem:[#allocation10 + $0x838] sm:$0xff]  ;;  %v1408_v8 = vld [vmem:[#allocation10 + $0x820] sm:$0xff]  ;;  %v1409_v9 = vld [vmem:[#allocation10 + $0x828] sm:$0xff] }
 0x227   : > { %1356 = vmatpush.msrb.mxu2 %v1321_v14  ;;  %1379 = vmatpush.msrb.mxu3 %v1322_v15  ;;  %1442 = vst [vmem:[#allocation1 + $0x1] ss:$2 sm:$0xff] %v1401_v12  ;;  %v2369_v25 = vld.sshfl [vmem:[#allocation1 + $0x10] sm:$0xff pattern:$0x75316420]  ;;  %v1406_v10 = vld [vmem:[#allocation10 + $0x810] sm:$0xff] }
 0x228   : > { %1260 = vmatpush.msrb.mxu0 %v1210_v16  ;;  %1283 = vmatpush.msrb.mxu1 %v1211_v18  ;;  %1444 = vst [vmem:[#allocation1 + $0x10] ss:$2 sm:$0xff] %v1402_v17  ;;  %v1407_v12 = vld [vmem:[#allocation10 + $0x818] sm:$0xff]  ;;  %v1404_v14 = vld [vmem:[#allocation10 + $0x800] sm:$0xff]  ;;  %v1405_v15 = vld [vmem:[#allocation10 + $0x808] sm:$0xff] }
 0x229   : > { %1357 = vmatpush.msrb.mxu2 %v1319_v19  ;;  %1380 = vmatpush.msrb.mxu3 %v1320_v21  ;;  %1446 = vst [vmem:[#allocation1 + $0x11] ss:$2 sm:$0xff] %v1403_v23 }
 0x22a   : > { %1261 = vmatpush.msrb.mxu0 %v1208_v22  ;;  %1284 = vmatpush.msrb.mxu1 %v1209_v24 }
 0x22b   : > { %1358 = vmatpush.msrb.mxu2 %v1317_v26  ;;  %1381 = vmatpush.msrb.mxu3 %v1318_v27 }
 0x22c   : > { %1262 = vmatpush.msrb.mxu0 %v1206_v28  ;;  %1285 = vmatpush.msrb.mxu1 %v1207_v29 }
 0x22d   : > { %1359 = vmatpush.msrb.mxu2 %v1315_v30  ;;  %1382 = vmatpush.msrb.mxu3 %v1316_v31 }
 0x22e   : > { %1263 = vmatpush.msrb.mxu0 %v1204_v32  ;;  %1286 = vmatpush.msrb.mxu1 %v1205_v33  ;;  %v1447_v16 = vld.sshfl [vmem:[#allocation1] sm:$0xff pattern:$0x75316420] }
 0x22f   : > { %1360 = vmatpush.msrb.mxu2 %v1313_v34  ;;  %1383 = vmatpush.msrb.mxu3 %v1314_v35 }
 0x230   : > { %1264 = vmatpush.msrb.mxu0 %v1202_v36  ;;  %1287 = vmatpush.msrb.mxu1 %v1203_v37  ;;  %v1448_v17 = vld.sshfl [vmem:[#allocation1 + $0x10] sm:$0xff pattern:$0x75316420] }
 0x231   : > { %1361 = vmatpush.msrb.mxu2 %v1311_v38  ;;  %1384 = vmatpush.msrb.mxu3 %v1312_v39 }
 0x232   : > { %1265 = vmatmul.f32.vlgmr.msrb.gmra.mxu0 %v2363_v60  ;;  %1288 = vmatmul.f32.vlgmr.msrb.gmra.mxu1 %v2363_v60  ;;  %v1420_v60 = vld [vmem:[#allocation10 + $0x880] sm:$0xff] }
 0x233   : > { %1451 = vmatpush.msra.mxu0 %v1434_v40  ;;  %1474 = vmatpush.msra.mxu1 %v1435_v41 }
 0x234   : > { %1362 = vmatpush.msrb.mxu2 %v1309_v42  ;;  %1385 = vmatpush.msrb.mxu3 %v1310_v43 }
 0x235   : > { %1452 = vmatpush.msra.mxu0 %v1432_v44  ;;  %1475 = vmatpush.msra.mxu1 %v1433_v45 }
 0x236   : > { %1363 = vmatpush.msrb.mxu2 %v1307_v46  ;;  %1386 = vmatpush.msrb.mxu3 %v1308_v47 }
 0x237   : > { %1453 = vmatpush.msra.mxu0 %v1430_v48  ;;  %1476 = vmatpush.msra.mxu1 %v1431_v49 }
 0x238   : > { %1364 = vmatpush.msrb.mxu2 %v1305_v50  ;;  %1387 = vmatpush.msrb.mxu3 %v1306_v51 }
 0x239   : > { %1454 = vmatpush.msra.mxu0 %v1428_v52  ;;  %1477 = vmatpush.msra.mxu1 %v1429_v53 }
 0x23a   : > { %1365 = vmatpush.msrb.mxu2 %v1303_v54  ;;  %1388 = vmatpush.msrb.mxu3 %v1304_v55 }
 0x23b   : > { %1268 = vmatmul.f32.gmra.mxu0 %v2365_v1  ;;  %1291 = vmatmul.f32.gmra.mxu1 %v2365_v1  ;;  %v1417_v1 = vld [vmem:[#allocation10 + $0x868] sm:$0xff] }
 0x23c   : > { %1366 = vmatmul.f32.vlgmr.msrb.gmra.mxu2 %v2367_v20  ;;  %1389 = vmatmul.f32.vlgmr.msrb.gmra.mxu3 %v2367_v20 }
 0x23d   : > { %1695 = vmatpush.msra.mxu2 %v1434_v40  ;;  %1455 = vmatpush.msra.mxu0 %v1426_v56 }
 0x23e   : > { %1711 = vmatpush.msra.mxu3 %v1435_v41  ;;  %1478 = vmatpush.msra.mxu1 %v1427_v11 }
 0x23f   : > { %1696 = vmatpush.msra.mxu2 %v1432_v44  ;;  %1456 = vmatpush.msra.mxu0 %v1424_v13 }
 0x240   : > { %1712 = vmatpush.msra.mxu3 %v1433_v45  ;;  %1479 = vmatpush.msra.mxu1 %v1425_v57 }
 0x241   : > { %1697 = vmatpush.msra.mxu2 %v1430_v48  ;;  %1457 = vmatpush.msra.mxu0 %v1422_v58 }
 0x242   : > { %1713 = vmatpush.msra.mxu3 %v1431_v49  ;;  %1480 = vmatpush.msra.mxu1 %v1423_v59 }
 0x243   : > { %1698 = vmatpush.msra.mxu2 %v1428_v52  ;;  %1458 = vmatpush.msra.mxu0 %v1420_v60 }
 0x244   : > { %1714 = vmatpush.msra.mxu3 %v1429_v53  ;;  %1481 = vmatpush.msra.mxu1 %v1421_v61 }
 0x245   : > { %1369 = vmatmul.f32.gmra.mxu2 %v2369_v25  ;;  %1392 = vmatmul.f32.gmra.mxu3 %v2369_v25 }
 0x246   : > { %1699 = vmatpush.msra.mxu2 %v1426_v56  ;;  %1459 = vmatpush.msra.mxu0 %v1418_v62 }
 0x247   : > { %1715 = vmatpush.msra.mxu3 %v1427_v11  ;;  %1482 = vmatpush.msra.mxu1 %v1419_v63 }
 0x248   : > { %1700 = vmatpush.msra.mxu2 %v1424_v13  ;;  %1460 = vmatpush.msra.mxu0 %v1416_v0  ;;  %v1501_v13 = vld [vmem:[#allocation11] sm:$0x3] }
 0x249   : > { %1716 = vmatpush.msra.mxu3 %v1425_v57  ;;  %1483 = vmatpush.msra.mxu1 %v1417_v1 }
 0x24a   : > { %1701 = vmatpush.msra.mxu2 %v1422_v58  ;;  %1461 = vmatpush.msra.mxu0 %v1414_v2 }
 0x24b   : > { %1717 = vmatpush.msra.mxu3 %v1423_v59  ;;  %1484 = vmatpush.msra.mxu1 %v1415_v3 }
 0x24c   : > { %1702 = vmatpush.msra.mxu2 %v1420_v60  ;;  %1462 = vmatpush.msra.mxu0 %v1412_v4 }
 0x24d   : > { %1718 = vmatpush.msra.mxu3 %v1421_v61  ;;  %1485 = vmatpush.msra.mxu1 %v1413_v5 }
 0x24e   : > { %1703 = vmatpush.msra.mxu2 %v1418_v62  ;;  %1463 = vmatpush.msra.mxu0 %v1410_v6 }
 0x24f   : > { %1719 = vmatpush.msra.mxu3 %v1419_v63  ;;  %1486 = vmatpush.msra.mxu1 %v1411_v7  ;;  %v1503_v63 = vperm.slane %v1501_v13, 0 }
 0x250   : > { %1704 = vmatpush.msra.mxu2 %v1416_v0  ;;  %1464 = vmatpush.msra.mxu0 %v1408_v8  ;;  %v1504_v0 = vperm.slane %v1501_v13, 1 }
 0x251   : > { %1720 = vmatpush.msra.mxu3 %v1417_v1  ;;  %1487 = vmatpush.msra.mxu1 %v1409_v9 }
 0x252   : > { %1705 = vmatpush.msra.mxu2 %v1414_v2  ;;  %1465 = vmatpush.msra.mxu0 %v1406_v10 }
 0x253   : > { %1721 = vmatpush.msra.mxu3 %v1415_v3  ;;  %1488 = vmatpush.msra.mxu1 %v1407_v12 }
 0x254   : > { %1706 = vmatpush.msra.mxu2 %v1412_v4  ;;  %1466 = vmatpush.msra.mxu0 %v1404_v14 }
 0x255   : > { %1722 = vmatpush.msra.mxu3 %v1413_v5  ;;  %1489 = vmatpush.msra.mxu1 %v1405_v15 }
 0x256   : > { %1467 = vmatmul.f32.vlgmr.msra.gmra.mxu0 %v1447_v16  ;;  %1490 = vmatmul.f32.vlgmr.msra.gmra.mxu1 %v1447_v16 }
 0x257   : > { %1707 = vmatpush.msra.mxu2 %v1410_v6  ;;  %1723 = vmatpush.msra.mxu3 %v1411_v7 }
 0x259   : > { %1708 = vmatpush.msra.mxu2 %v1408_v8  ;;  %1724 = vmatpush.msra.mxu3 %v1409_v9 }
 0x25b   : > { %1709 = vmatpush.msra.mxu2 %v1406_v10  ;;  %1725 = vmatpush.msra.mxu3 %v1407_v12 }
 0x25d   : > { %1710 = vmatpush.msra.mxu2 %v1404_v14  ;;  %1726 = vmatpush.msra.mxu3 %v1405_v15 }
 0x25e   : > { %1470 = vmatmul.f32.vlgmr.msra.gmra.mxu2 %v1448_v17  ;;  %1493 = vmatmul.f32.vlgmr.msra.gmra.mxu3 %v1448_v17 }
 0x264   : > { %v703_v18 = vpop.f32.mrf.mxu0  ;;  %v726_v19 = vpop.f32.mrf.mxu1 }
 0x26c   : > { %v706_v20 = vpop.f32.mrf.mxu0  ;;  %v729_v21 = vpop.f32.mrf.mxu1 }
 0x273   : > { %v764_v22 = vpop.f32.mrf.mxu2  ;;  %v787_v23 = vpop.f32.mrf.mxu3 }
 0x274   : > { %v765_v42 = vadd.f32 %v764_v22, %v703_v18  ;;  %v788_v43 = vadd.f32 %v787_v23, %v726_v19 }
 0x277   : > { %v861_v24 = vpop.f32.mrf.mxu0  ;;  %v884_v25 = vpop.f32.mrf.mxu1 }
 0x278   : > { %v890_v44 = vadd.f32 %v861_v24, %v765_v42  ;;  %v891_v45 = vadd.f32 %v884_v25, %v788_v43 }
 0x27c   : > { %v767_v26 = vpop.f32.mrf.mxu2  ;;  %v790_v27 = vpop.f32.mrf.mxu3 }
 0x27d   : > { %v768_v57 = vadd.f32 %v767_v26, %v706_v20  ;;  %v791_v58 = vadd.f32 %v790_v27, %v729_v21 }
 0x280   : > { %v864_v28 = vpop.f32.mrf.mxu0  ;;  %v887_v29 = vpop.f32.mrf.mxu1 }
 0x281   : > { %v892_v3 = vadd.f32 %v864_v28, %v768_v57  ;;  %v893_v4 = vadd.f32 %v887_v29, %v791_v58 }
 0x287   : > { %v962_v30 = vpop.f32.mrf.mxu2  ;;  %v985_v31 = vpop.f32.mrf.mxu3 }
 0x288   : > { %v991_v48 = vadd.f32 %v962_v30, %v890_v44  ;;  %v992_v49 = vadd.f32 %v985_v31, %v891_v45 }
 0x28c   : > { %v1063_v32 = vpop.f32.mrf.mxu0  ;;  %v1086_v33 = vpop.f32.mrf.mxu1 }
 0x28d   : > { %v1092_v52 = vadd.f32 %v1063_v32, %v991_v48  ;;  %v1093_v53 = vadd.f32 %v1086_v33, %v992_v49 }
 0x291   : > { %v965_v34 = vpop.f32.mrf.mxu2  ;;  %v988_v35 = vpop.f32.mrf.mxu3 }
 0x292   : > { %v993_v7 = vadd.f32 %v965_v34, %v892_v3  ;;  %v994_v8 = vadd.f32 %v988_v35, %v893_v4 }
 0x296   : > { %v1066_v36 = vpop.f32.mrf.mxu0  ;;  %v1089_v37 = vpop.f32.mrf.mxu1 }
 0x297   : > { %v1094_v15 = vadd.f32 %v1066_v36, %v993_v7  ;;  %v1095_v16 = vadd.f32 %v1089_v37, %v994_v8 }
 0x29d   : > { %v1164_v38 = vpop.f32.mrf.mxu2  ;;  %v1187_v39 = vpop.f32.mrf.mxu3 }
 0x29e   : > { %v1193_v54 = vadd.f32 %v1164_v38, %v1092_v52  ;;  %v1194_v55 = vadd.f32 %v1187_v39, %v1093_v53 }
 0x2a6   : > { %v1167_v46 = vpop.f32.mrf.mxu2  ;;  %v1190_v47 = vpop.f32.mrf.mxu3 }
 0x2a7   : > { %v1195_v17 = vadd.f32 %v1167_v46, %v1094_v15  ;;  %v1196_v18 = vadd.f32 %v1190_v47, %v1095_v16 }
 0x2af   : > { %v1266_v40 = vpop.f32.mrf.mxu0  ;;  %v1289_v41 = vpop.f32.mrf.mxu1 }
 0x2b0   : > { %v1295_v59 = vadd.f32 %v1266_v40, %v1193_v54  ;;  %v1296_v60 = vadd.f32 %v1289_v41, %v1194_v55 }
 0x2b8   : > { %v1269_v50 = vpop.f32.mrf.mxu0  ;;  %v1292_v51 = vpop.f32.mrf.mxu1 }
 0x2b9   : > { %v1297_v19 = vadd.f32 %v1269_v50, %v1195_v17  ;;  %v1298_v20 = vadd.f32 %v1292_v51, %v1196_v18 }
 0x2bf   : > { %v1367_v56 = vpop.f32.mrf.mxu2  ;;  %v1390_v11 = vpop.f32.mrf.mxu3 }
 0x2c0   : > { %v1396_v61 = vadd.f32 %v1367_v56, %v1295_v59  ;;  %v1397_v62 = vadd.f32 %v1390_v11, %v1296_v60 }
 0x2c8   : > { %v1370_v12 = vpop.f32.mrf.mxu2  ;;  %v1393_v14 = vpop.f32.mrf.mxu3 }
 0x2c9   : > { %v1398_v21 = vadd.f32 %v1370_v12, %v1297_v19  ;;  %v1399_v22 = vadd.f32 %v1393_v14, %v1298_v20 }
 0x2d3   : > { %v1468_v1 = vpop.f32.mrf.mxu0  ;;  %v1491_v2 = vpop.f32.mrf.mxu1 }
 0x2d4   : > { %v1497_v5 = vadd.f32 %v1468_v1, %v1396_v61  ;;  %v1498_v6 = vadd.f32 %v1491_v2, %v1397_v62 }
 0x2d6   : > { %v1507_v9 = vadd.f32 %v1503_v63, %v1497_v5  ;;  %v1508_v10 = vadd.f32 %v1504_v0, %v1498_v6 }
 0x2d8   : > { %1511 = vst [vmem:[%s347_s20] sm:$0xff] %v1507_v9 }
 0x2d9   : > { %1512 = vst [vmem:[%s347_s20 + $0x8] sm:$0xff] %v1508_v10 }
 0x2e1   : > { %v1471_v23 = vpop.f32.mrf.mxu2  ;;  %v1494_v24 = vpop.f32.mrf.mxu3 }
 0x2e2   : > { %v1499_v25 = vadd.f32 %v1471_v23, %v1398_v21  ;;  %v1500_v26 = vadd.f32 %v1494_v24, %v1399_v22 }
 0x2e4   : > { %v1509_v27 = vadd.f32 %v1503_v63, %v1499_v25  ;;  %v1510_v28 = vadd.f32 %v1504_v0, %v1500_v26 }
 0x2e6   : > { %1513 = vst [vmem:[%s347_s20 + $0x10] sm:$0xff] %v1509_v27 }
 0x2e7   : > { %1514 = vst [vmem:[%s347_s20 + $0x18] sm:$0xff] %v1510_v28 }
 0x2e8   : > { %2042 = shalt.err (!%p2039_p10)
}
 0x2e9   : > { %s2110_s15 = smov 256   ;;  %s2111_s20 = smov 16  }
 0x2ea   : > { %1755 = dma.vmem_to_hbm [thread:$0]  (%p2246_p7), %s1529_s12, 512, %s1531_s13, %s1516_s25, %s2110_s15, %s2110_s15, %s2111_s20  }
 0x2eb PF: > { %s1545_s8 = sand.u32 1, %s2085_s21   ;;  %p2430_p12 = scmp.ge.s32.totalorder %s2097_s24, 2 }
 0x2ec   : > { %s1546_s16 = scalar_lea.sflag [#allocation5], %s1545_s8 }
 0x2ed   : > { %p1778_p13 = pnand %p2430_p12, %p2182_p6 }
 0x2ef   : > { %p1779_p0 = pneg %p1778_p13 }
 0x2f1   : > { %2080 = dma.done.wait (%p1779_p0), %s1546_s16, 512  }
 0x2f2   : > { %2082 = vsyncadd (%p1779_p0), %s1546_s16, 4294966784  ;;  %p20_p3 = scmp.ge.s32.totalorder %s2232_s29, 4   ;;  %s2431_s21 = smov %s2089_s22 }
 0x2f3   : > { %s2432_s22 = smov %s2093_s23  ;;  %s2433_s23 = smov %s2242_s9 }
 0x2f4   : > { %s2434_s24 = smov %s2232_s29  ;;  %22 = sbr.rel (!%p20_p3) target bundleno = 7 (0x7), region = 153 }
 0x2f9   :  { %1552 = vsyncpa [#allocation4], 1 }
 0x2fa   :  { %1554 = vsyncpa [#allocation4 + $0x1], 1 }
 0x2fb   :  { %1555 = vsyncpa [#allocation9], 1 }
 0x2fc   :  { %1556 = vsyncpa [#allocation12], 1 }
 0x2fd   :  { %1557 = vsyncpa [#allocation5], 1 }
 0x2fe   :  { %1559 = vsyncpa [#allocation5 + $0x1], 1 }
 0x2ff   :  { %1560 = vsyncpa [#allocation6], 1 }
 0x300   :  { %1562 = vsyncpa [#allocation6 + $0x1], 1 }

</bundles_post_ra>
